<compile_context>
chip_gen: v7x
topology: tpu7x:2x2x1
jax: 0.10.0
libtpu: 0.0.40
codegen_flags: <defaults>
</compile_context>

<pallas_src>
import functools

import jax
import jax.numpy as jnp
from jax import lax
from jax.experimental import pallas as pl
from jax.experimental.pallas import tpu as pltpu


def _bn_channel(x, eps=1e-5):
    """Training-mode BatchNorm1d over the last axis (channels); batch statistics
    (biased variance) over axis 0.  gamma=1 / beta=0 (init values) folded out."""
    inv_n = 1.0 / float(x.shape[0])
    mean = jnp.sum(x, axis=0, keepdims=True) * inv_n
    d = x - mean
    var = jnp.sum(d * d, axis=0, keepdims=True) * inv_n
    return d * lax.rsqrt(var + eps)


def encoder_kernel(x_ref, dftf_ref, dfti_ref, wr_ref, wi_ref,
                   w1_ref, b1_ref, w2_ref, b2_ref,
                   o_ref, act_ref, *, T, tau, n_freq_pad, batch, output_all):
    layer = pl.program_id(0)

    # First grid step: load the encoder input into the resident activation.
    @pl.when(layer == 0)
    def _():
        act_ref[...] = x_ref[...]

    act = act_ref[...]                                   # (N, H) f32, rows (b, s)
    N, H = act.shape
    Fp = n_freq_pad
    B = batch
    S = N // B
    inv_tau = 1.0 / tau

    # ---------------- FilterLayer ----------------
    # rfft along seq (norm='ortho') as a batched MXU matmul with the per-batch
    # operator [Cr;Ci] broadcast along B (no kron, no transposes).
    act3 = act.reshape(B, S, H)
    X = jnp.einsum('bfs,bsh->bfh', dftf_ref[...], act3.astype(jnp.bfloat16),
                   preferred_element_type=jnp.float32)            # (B, 2Fp, H)
    wr = wr_ref[0]                                                # (Fp, H), zero rows >= F
    wi = wi_ref[0]
    Xr = X[:, :Fp, :]
    Xi = X[:, Fp:, :]
    Yr = Xr * wr[None] - Xi * wi[None]                            # learned complex filter
    Yi = Xr * wi[None] + Xi * wr[None]
    Y = jnp.concatenate([Yr, Yi], axis=1)                         # (B, 2Fp, H)
    # irfft back to length S (norm='ortho'): batched matmul with [Ar|Ai].
    fft_out = jnp.einsum('bsf,bfh->bsh', dfti_ref[...], Y.astype(jnp.bfloat16),
                         preferred_element_type=jnp.float32)      # (B, S, H)
    # TODO(synk): FilterLayer.out_dropout treated as identity (eval-mode dropout).
    h = _bn_channel(fft_out.reshape(N, H) + act)                  # FilterLayer.bn

    # ---------------- Intermediate ----------------
    a1 = jnp.dot(h.astype(jnp.bfloat16), w1_ref[0],
                 preferred_element_type=jnp.float32) + b1_ref[0]  # (N, 4H) lane-dense
    a1 = _bn_channel(a1)                                          # bn_1

    # First LIF (tau=2, decay_input=True, v_th=1, hard reset to 0) over T steps
    # with constant input a1.  Spikes are exactly {0,1} -> bf16 cast is lossless
    # and feeds the MXU directly; kept as live values (no scratch round-trip).
    v = jnp.zeros_like(a1)
    spikes = []
    for _ in range(T):
        v = v + (a1 - v) * inv_tau
        spk = (v >= 1.0).astype(jnp.float32)
        spikes.append(spk.astype(jnp.bfloat16))
        v = v * (1.0 - spk)
    spk_all = jnp.concatenate(spikes, axis=0)                     # (T*N, 4H)

    # dense_2 for all T timesteps as one stacked (T*N, 4H) @ (4H, H) matmul.
    h2 = jnp.dot(spk_all, w2_ref[0],
                 preferred_element_type=jnp.float32) + b2_ref[0]  # (T*N, H)
    # TODO(synk): Intermediate.dropout treated as identity (eval-mode dropout).
    h2 = h2.reshape(T, N, H) + h[None]                            # residual per timestep

    # bn_2: spikingjelly multi-step BatchNorm1d -> stats over the flattened
    # (T*N, H) slab; normalization applied on the fly inside the LIF loop.
    inv_cnt = 1.0 / float(T * N)
    h2f = h2.reshape(T * N, H)
    mean2 = jnp.sum(h2f, axis=0, keepdims=True) * inv_cnt
    d2 = h2f - mean2
    var2 = jnp.sum(d2 * d2, axis=0, keepdims=True) * inv_cnt
    rstd2 = lax.rsqrt(var2 + 1e-5)

    # Last LIF over T timesteps + temporal mean (slices the live h2 value).
    v = jnp.zeros((N, H), jnp.float32)
    acc = jnp.zeros((N, H), jnp.float32)
    for t in range(T):
        xt = (h2[t] - mean2) * rstd2                              # bn_2 on the fly
        v = v + (xt - v) * inv_tau
        spk = (v >= 1.0).astype(jnp.float32)
        acc = acc + spk
        v = v * (1.0 - spk)
    out = _bn_channel(acc * (1.0 / T))                            # last_bn

    act_ref[...] = out                                            # carry to next layer
    if output_all:
        o_ref[0] = out                                            # every layer's output
    else:
        @pl.when(layer == pl.num_programs(0) - 1)
        def _():
            o_ref[0] = out                                        # final layer only


def make_dft_operators(batch, seq_len):
    """Real operators implementing rfft / irfft (norm='ortho') along the sequence
    axis, broadcast along the batch dim for a canonical batched MXU matmul.
    Re/Im halves are padded to a sublane multiple (Fp) for aligned slicing."""
    F = seq_len // 2 + 1
    Fp = ((F + 7) // 8) * 8
    t = jnp.arange(seq_len, dtype=jnp.float32)
    k = jnp.arange(F, dtype=jnp.float32)
    ang = 2.0 * jnp.pi * k[:, None] * t[None, :] / seq_len        # (F, S)
    inv_sqrt_n = 1.0 / jnp.sqrt(jnp.float32(seq_len))
    Cr = jnp.cos(ang) * inv_sqrt_n                                # Re part of rfft
    Ci = -jnp.sin(ang) * inv_sqrt_n                               # Im part of rfft
    c = jnp.full((F,), 2.0, jnp.float32).at[0].set(1.0)
    if seq_len % 2 == 0:
        c = c.at[F - 1].set(1.0)                                  # Nyquist weight
    Ar = (c[None, :] * jnp.cos(ang.T)) * inv_sqrt_n               # (S, F) irfft on Re
    Ai = (-c[None, :] * jnp.sin(ang.T)) * inv_sqrt_n              # (S, F) irfft on Im

    Cp = jnp.zeros((2 * Fp, seq_len), jnp.float32)
    Cp = Cp.at[:F].set(Cr).at[Fp:Fp + F].set(Ci)                  # [Cr ; Ci]  (2Fp, S)
    Ap = jnp.zeros((seq_len, 2 * Fp), jnp.float32)
    Ap = Ap.at[:, :F].set(Ar).at[:, Fp:Fp + F].set(Ai)            # [Ar | Ai]  (S, 2Fp)

    dft_fwd = jnp.broadcast_to(Cp[None], (batch, 2 * Fp, seq_len)).astype(jnp.bfloat16)
    dft_inv = jnp.broadcast_to(Ap[None], (batch, seq_len, 2 * Fp)).astype(jnp.bfloat16)
    return dft_fwd, dft_inv, Fp


def init_layer_params(key, n_layers, seq_len, hidden, n_freq_pad):
    """Per-layer Layer parameters, stacked with a leading n_layers dim.
    SSR.init_weights: nn.Linear weights ~ N(0, 0.02) drawn per layer, biases zero.
    complex_weight is an nn.Parameter untouched by init_weights, so the
    deep-copied layers share one draw -> replicated across layers."""
    F = seq_len // 2 + 1
    kcw, klin = jax.random.split(key)
    cw = 0.02 * jax.random.normal(kcw, (F, hidden, 2), jnp.float32)
    Wr1 = jnp.zeros((n_freq_pad, hidden), jnp.float32).at[:F].set(cw[..., 0])
    Wi1 = jnp.zeros((n_freq_pad, hidden), jnp.float32).at[:F].set(cw[..., 1])
    Wr = jnp.stack([Wr1] * n_layers)
    Wi = jnp.stack([Wi1] * n_layers)
    lin_keys = jax.random.split(klin, 2 * n_layers)
    W1 = jnp.stack([0.02 * jax.random.normal(lin_keys[2 * l], (hidden, 4 * hidden),
                                             jnp.float32) for l in range(n_layers)])
    W2 = jnp.stack([0.02 * jax.random.normal(lin_keys[2 * l + 1], (4 * hidden, hidden),
                                             jnp.float32) for l in range(n_layers)])
    b1 = jnp.zeros((n_layers, 1, 4 * hidden), jnp.float32)
    b2 = jnp.zeros((n_layers, 1, hidden), jnp.float32)
    return dict(Wr=Wr, Wi=Wi, W1=W1.astype(jnp.bfloat16), b1=b1,
                W2=W2.astype(jnp.bfloat16), b2=b2)


def _vmem_ceiling_bytes():
    cap = 128 * 1024 * 1024
    try:
        info = pltpu.get_tpu_info()
        for name in ("vmem_capacity_bytes", "vmem_size_bytes", "vmem_bytes"):
            v = getattr(info, name, None)
            if v:
                cap = int(v)
                break
    except Exception:
        pass
    return (cap * 3) // 4                       # leave headroom below physical VMEM


def _vmem_limit_bytes(B, S, H, T, Fp):
    N = B * S
    f32, bf16 = 4, 2
    consts = N * H * f32 + 2 * (B * 2 * Fp * S) * bf16            # x2d + DFT operators
    per_layer_w = (2 * Fp * H * f32 + H * 4 * H * bf16 + 4 * H * f32
                   + 4 * H * H * bf16 + H * f32)
    weights = 2 * per_layer_w                                     # double-buffered
    out_blk = 2 * N * H * f32                                     # double-buffered output
    scratch = N * H * f32                                         # resident activation
    temps = (T * N * 4 * H * bf16                                 # stacked spikes
             + 3 * N * 4 * H * f32                                # a1 / v / temps
             + 3 * T * N * H * f32                                # h2 / d2 / lif2 temps
             + 4 * B * 2 * Fp * H * f32)                          # X / Y / filter temps
    need = consts + weights + out_blk + scratch + temps
    return int(min(_vmem_ceiling_bytes(), max(2 * need, 32 * 1024 * 1024)))


def encoder_forward(x, params, dft_ops, *, n_layers=2, T=4, tau=2.0,
                    output_all_encoded_layers=True):
    B, S, H = x.shape
    N = B * S
    dft_fwd, dft_inv, Fp = dft_ops
    x2d = x.reshape(N, H).astype(jnp.float32)
    n_out = n_layers if output_all_encoded_layers else 1

    kernel = functools.partial(encoder_kernel, T=T, tau=tau, n_freq_pad=Fp,
                               batch=B, output_all=output_all_encoded_layers)

    inputs = (x2d, dft_fwd, dft_inv, params['Wr'], params['Wi'],
              params['W1'], params['b1'], params['W2'], params['b2'])

    vmem_limit = _vmem_limit_bytes(B, S, H, T, Fp)

    def build(single_buffer_consts):
        def const_spec(arr):
            shape = arr.shape
            kw = {}
            if single_buffer_consts:
                # Constant-block-index inputs never re-DMA across the layer grid:
                # single-buffer them to halve their VMEM footprint.
                kw["pipeline_mode"] = pl.Buffered(1)
            return pl.BlockSpec(shape, lambda *_: (0,) * len(shape), **kw)

        def layer_spec(arr):
            ndim = arr.ndim
            shape = (1,) + arr.shape[1:]
            return pl.BlockSpec(shape, lambda l: (l,) + (0,) * (ndim - 1))

        in_specs = ([const_spec(x2d), const_spec(dft_fwd), const_spec(dft_inv)]
                    + [layer_spec(a) for a in inputs[3:]])
        if output_all_encoded_layers:
            out_spec = pl.BlockSpec((1, N, H), lambda l: (l, 0, 0))
        else:
            out_spec = pl.BlockSpec((1, N, H), lambda l: (0, 0, 0))

        return pl.pallas_call(
            kernel,
            out_shape=jax.ShapeDtypeStruct((n_out, N, H), jnp.float32),
            grid_spec=pltpu.PrefetchScalarGridSpec(
                num_scalar_prefetch=0,
                grid=(n_layers,),
                in_specs=in_specs,
                out_specs=out_spec,
                scratch_shapes=[
                    pltpu.VMEM((N, H), jnp.float32),   # resident activation (layer carry)
                ]),
            compiler_params=pltpu.CompilerParams(
                dimension_semantics=("arbitrary",),    # sequential layer dependency
                vmem_limit_bytes=vmem_limit))

    try:
        out = jax.block_until_ready(build(True)(*inputs))
    except Exception:
        # pipeline_mode=pl.Buffered(1) unsupported on this JAX/libtpu: fall back
        # to default double-buffering (correctness identical).
        out = jax.block_until_ready(build(False)(*inputs))

    outs = out.reshape(n_out, B, S, H)
    return [outs[i] for i in range(n_out)]


if __name__ == "__main__":
    B, S, H = 2, 8, 32          # batch, max_seq_length, hidden_size
    n_layers, T = 2, 4

    key = jax.random.PRNGKey(0)
    kx, kp = jax.random.split(key)
    x = jax.random.normal(kx, (B, S, H), jnp.float32)

    dft_ops = make_dft_operators(B, S)
    params = init_layer_params(kp, n_layers, S, H, dft_ops[2])

    # All encoder layers (as used by SSR.forward).
    outs = encoder_forward(x, params, dft_ops, n_layers=n_layers, T=T,
                           output_all_encoded_layers=True)
    outs = [jax.block_until_ready(o) for o in outs]
    assert len(outs) == n_layers
    assert all(o.shape == (B, S, H) and o.dtype == jnp.float32 for o in outs)
    assert all(bool(jnp.all(jnp.isfinite(o))) for o in outs)

    # Final-layer-only path (no intermediate HBM writeback).
    last = encoder_forward(x, params, dft_ops, n_layers=n_layers, T=T,
                           output_all_encoded_layers=False)
    last = [jax.block_until_ready(o) for o in last]
    assert len(last) == 1 and last[0].shape == (B, S, H)
    assert bool(jnp.allclose(last[0], outs[-1], atol=1e-4, rtol=1e-4))

    print("KERNEL_OK")
</pallas_src>

<mosaic_0001>
module attributes {stable_mosaic.version = 11 : i64} {
  func.func @encoder_kernel(%arg0: i32, %arg1: memref<16x32xf32, #tpu.memory_space<vmem>>, %arg2: memref<2x16x8xbf16, #tpu.memory_space<vmem>>, %arg3: memref<2x8x16xbf16, #tpu.memory_space<vmem>>, %arg4: memref<1x8x32xf32, #tpu.memory_space<vmem>>, %arg5: memref<1x8x32xf32, #tpu.memory_space<vmem>>, %arg6: memref<1x32x128xbf16, #tpu.memory_space<vmem>>, %arg7: memref<1x1x128xf32, #tpu.memory_space<vmem>>, %arg8: memref<1x128x32xbf16, #tpu.memory_space<vmem>>, %arg9: memref<1x1x32xf32, #tpu.memory_space<vmem>>, %arg10: memref<1x16x32xf32, #tpu.memory_space<vmem>>, %arg11: memref<16x32xf32, #tpu.memory_space<vmem>>) attributes {dimension_semantics = [#tpu.dimension_semantics<arbitrary>], iteration_bounds = array<i64: 2>, scalar_prefetch = 0 : i64, scratch_operands = 1 : i64, tpu.core_type = #tpu.core_type<tc>, window_params = [{pipeline_mode = #tpu.pipeline_mode<synchronous>, transform_indices = @transform_0, window_bounds = array<i64: 16, 32>}, {pipeline_mode = #tpu.pipeline_mode<synchronous>, transform_indices = @transform_1, window_bounds = array<i64: 2, 16, 8>}, {pipeline_mode = #tpu.pipeline_mode<synchronous>, transform_indices = @transform_2, window_bounds = array<i64: 2, 8, 16>}, {transform_indices = @transform_3, window_bounds = array<i64: 1, 8, 32>}, {transform_indices = @transform_4, window_bounds = array<i64: 1, 8, 32>}, {transform_indices = @transform_5, window_bounds = array<i64: 1, 32, 128>}, {transform_indices = @transform_6, window_bounds = array<i64: 1, 1, 128>}, {transform_indices = @transform_7, window_bounds = array<i64: 1, 128, 32>}, {transform_indices = @transform_8, window_bounds = array<i64: 1, 1, 32>}, {transform_indices = @transform_9, window_bounds = array<i64: 1, 16, 32>}]} {
    %c0_i32 = arith.constant 0 : i32
    %0 = arith.cmpi eq, %arg0, %c0_i32 : i32
    %1 = arith.extui %0 : i1 to i32
    %c0_i32_0 = arith.constant 0 : i32
    %2 = arith.cmpi ne, %1, %c0_i32_0 : i32
    scf.if %2 {
      %c0_80 = arith.constant 0 : index
      %c0_81 = arith.constant 0 : index
      %240 = vector.load %arg1[%c0_80, %c0_81] : memref<16x32xf32, #tpu.memory_space<vmem>>, vector<16x32xf32>
      %c0_82 = arith.constant 0 : index
      %c0_83 = arith.constant 0 : index
      %241 = vector.load %arg11[%c0_82, %c0_83] : memref<16x32xf32, #tpu.memory_space<vmem>>, vector<16x32xf32>
      tpu.vector_store %arg11[%c0_82, %c0_83], %240 {strides = array<i32>} : memref<16x32xf32, #tpu.memory_space<vmem>>, vector<16x32xf32>,
    } else {
    }
    %c0 = arith.constant 0 : index
    %c0_1 = arith.constant 0 : index
    %3 = vector.load %arg11[%c0, %c0_1] : memref<16x32xf32, #tpu.memory_space<vmem>>, vector<16x32xf32>
    %4 = vector.shape_cast %3 : vector<16x32xf32> to vector<2x8x32xf32>
    %c0_2 = arith.constant 0 : index
    %c0_3 = arith.constant 0 : index
    %c0_4 = arith.constant 0 : index
    %5 = vector.load %arg2[%c0_2, %c0_3, %c0_4] : memref<2x16x8xbf16, #tpu.memory_space<vmem>>, vector<2x16x8xbf16>
    %6 = arith.truncf %4 : vector<2x8x32xf32> to vector<2x8x32xbf16>
    "tpu.trace_start"() <{level = 10 : i32, message = "bfs,bsh->bfh"}> : () -> ()
    %cst = arith.constant dense<0.000000e+00> : vector<2x16x32xf32>
    %7 = tpu.matmul %5, %6, %cst {dimension_numbers = #tpu.dot_dimension_numbers<[2], [1], [1], [2], [0, 0, 0, 1, 1, 2], [0], [0]>} : vector<2x16x8xbf16>, vector<2x8x32xbf16>, vector<2x16x32xf32> -> vector<2x16x32xf32>
    "tpu.trace_stop"() : () -> ()
    %c0_5 = arith.constant 0 : index
    %c0_6 = arith.constant 0 : index
    %c0_7 = arith.constant 0 : index
    %8 = vector.load %arg4[%c0_5, %c0_6, %c0_7] : memref<1x8x32xf32, #tpu.memory_space<vmem>>, vector<1x8x32xf32>
    %9 = vector.shape_cast %8 : vector<1x8x32xf32> to vector<8x32xf32>
    %c0_8 = arith.constant 0 : index
    %c0_9 = arith.constant 0 : index
    %c0_10 = arith.constant 0 : index
    %10 = vector.load %arg5[%c0_8, %c0_9, %c0_10] : memref<1x8x32xf32, #tpu.memory_space<vmem>>, vector<1x8x32xf32>
    %11 = vector.shape_cast %10 : vector<1x8x32xf32> to vector<8x32xf32>
    %12 = vector.extract_strided_slice %7 {offsets = [0, 0, 0], sizes = [2, 8, 32], strides = [1, 1, 1]} : vector<2x16x32xf32> to vector<2x8x32xf32>
    %13 = vector.extract_strided_slice %7 {offsets = [0, 8, 0], sizes = [2, 8, 32], strides = [1, 1, 1]} : vector<2x16x32xf32> to vector<2x8x32xf32>
    %14 = vector.shape_cast %9 : vector<8x32xf32> to vector<1x8x32xf32>
    %15 = vector.broadcast %14 : vector<1x8x32xf32> to vector<2x8x32xf32>
    %16 = arith.mulf %12, %15 : vector<2x8x32xf32>
    %17 = vector.shape_cast %11 : vector<8x32xf32> to vector<1x8x32xf32>
    %18 = vector.broadcast %17 : vector<1x8x32xf32> to vector<2x8x32xf32>
    %19 = arith.mulf %13, %18 : vector<2x8x32xf32>
    %20 = arith.subf %16, %19 : vector<2x8x32xf32>
    %21 = vector.shape_cast %11 : vector<8x32xf32> to vector<1x8x32xf32>
    %22 = vector.broadcast %21 : vector<1x8x32xf32> to vector<2x8x32xf32>
    %23 = arith.mulf %12, %22 : vector<2x8x32xf32>
    %24 = vector.shape_cast %9 : vector<8x32xf32> to vector<1x8x32xf32>
    %25 = vector.broadcast %24 : vector<1x8x32xf32> to vector<2x8x32xf32>
    %26 = arith.mulf %13, %25 : vector<2x8x32xf32>
    %27 = arith.addf %23, %26 : vector<2x8x32xf32>
    %28 = tpu.concatenate %20, %27 in 1 : vector<2x8x32xf32>, vector<2x8x32xf32> -> vector<2x16x32xf32>
    %c0_11 = arith.constant 0 : index
    %c0_12 = arith.constant 0 : index
    %c0_13 = arith.constant 0 : index
    %29 = vector.load %arg3[%c0_11, %c0_12, %c0_13] : memref<2x8x16xbf16, #tpu.memory_space<vmem>>, vector<2x8x16xbf16>
    %30 = arith.truncf %28 : vector<2x16x32xf32> to vector<2x16x32xbf16>
    "tpu.trace_start"() <{level = 10 : i32, message = "bsf,bfh->bsh"}> : () -> ()
    %cst_14 = arith.constant dense<0.000000e+00> : vector<2x8x32xf32>
    %31 = tpu.matmul %29, %30, %cst_14 {dimension_numbers = #tpu.dot_dimension_numbers<[2], [1], [1], [2], [0, 0, 0, 1, 1, 2], [0], [0]>} : vector<2x8x16xbf16>, vector<2x16x32xbf16>, vector<2x8x32xf32> -> vector<2x8x32xf32>
    "tpu.trace_stop"() : () -> ()
    %32 = vector.shape_cast %31 : vector<2x8x32xf32> to vector<16x32xf32>
    %33 = arith.addf %32, %3 : vector<16x32xf32>
    %cst_15 = arith.constant dense<0.000000e+00> : vector<32xf32>
    %34 = vector.multi_reduction <add>, %33, %cst_15 [0] : vector<16x32xf32> to vector<32xf32>
    %35 = vector.shape_cast %34 : vector<32xf32> to vector<1x32xf32>
    %cst_16 = arith.constant 6.250000e-02 : f32
    %36 = vector.broadcast %cst_16 : f32 to vector<1x32xf32>
    %37 = arith.mulf %35, %36 : vector<1x32xf32>
    %38 = vector.broadcast %37 : vector<1x32xf32> to vector<16x32xf32>
    %39 = arith.subf %33, %38 : vector<16x32xf32>
    %40 = arith.mulf %39, %39 : vector<16x32xf32>
    %cst_17 = arith.constant dense<0.000000e+00> : vector<32xf32>
    %41 = vector.multi_reduction <add>, %40, %cst_17 [0] : vector<16x32xf32> to vector<32xf32>
    %42 = vector.shape_cast %41 : vector<32xf32> to vector<1x32xf32>
    %cst_18 = arith.constant 6.250000e-02 : f32
    %43 = vector.broadcast %cst_18 : f32 to vector<1x32xf32>
    %44 = arith.mulf %42, %43 : vector<1x32xf32>
    %cst_19 = arith.constant 9.99999974E-6 : f32
    %45 = vector.broadcast %cst_19 : f32 to vector<1x32xf32>
    %46 = arith.addf %44, %45 : vector<1x32xf32>
    %47 = math.rsqrt %46 : vector<1x32xf32>
    %48 = vector.broadcast %47 : vector<1x32xf32> to vector<16x32xf32>
    %49 = arith.mulf %39, %48 : vector<16x32xf32>
    %50 = arith.truncf %49 : vector<16x32xf32> to vector<16x32xbf16>
    %c0_20 = arith.constant 0 : index
    %c0_21 = arith.constant 0 : index
    %c0_22 = arith.constant 0 : index
    %51 = vector.load %arg6[%c0_20, %c0_21, %c0_22] : memref<1x32x128xbf16, #tpu.memory_space<vmem>>, vector<1x32x128xbf16>
    %52 = vector.shape_cast %51 : vector<1x32x128xbf16> to vector<32x128xbf16>
    %cst_23 = arith.constant dense<0.000000e+00> : vector<16x128xf32>
    %53 = tpu.matmul %50, %52, %cst_23 {dimension_numbers = #tpu.dot_dimension_numbers<[1], [0], [0], [1], [0, 0, 1, 1], [], []>} : vector<16x32xbf16>, vector<32x128xbf16>, vector<16x128xf32> -> vector<16x128xf32>
    %c0_24 = arith.constant 0 : index
    %c0_25 = arith.constant 0 : index
    %c0_26 = arith.constant 0 : index
    %54 = vector.load %arg7[%c0_24, %c0_25, %c0_26] : memref<1x1x128xf32, #tpu.memory_space<vmem>>, vector<1x1x128xf32>
    %55 = vector.shape_cast %54 : vector<1x1x128xf32> to vector<1x128xf32>
    %56 = vector.broadcast %55 : vector<1x128xf32> to vector<16x128xf32>
    %57 = arith.addf %53, %56 : vector<16x128xf32>
    %cst_27 = arith.constant dense<0.000000e+00> : vector<128xf32>
    %58 = vector.multi_reduction <add>, %57, %cst_27 [0] : vector<16x128xf32> to vector<128xf32>
    %59 = vector.shape_cast %58 : vector<128xf32> to vector<1x128xf32>
    %cst_28 = arith.constant 6.250000e-02 : f32
    %60 = vector.broadcast %cst_28 : f32 to vector<1x128xf32>
    %61 = arith.mulf %59, %60 : vector<1x128xf32>
    %62 = vector.broadcast %61 : vector<1x128xf32> to vector<16x128xf32>
    %63 = arith.subf %57, %62 : vector<16x128xf32>
    %64 = arith.mulf %63, %63 : vector<16x128xf32>
    %cst_29 = arith.constant dense<0.000000e+00> : vector<128xf32>
    %65 = vector.multi_reduction <add>, %64, %cst_29 [0] : vector<16x128xf32> to vector<128xf32>
    %66 = vector.shape_cast %65 : vector<128xf32> to vector<1x128xf32>
    %cst_30 = arith.constant 6.250000e-02 : f32
    %67 = vector.broadcast %cst_30 : f32 to vector<1x128xf32>
    %68 = arith.mulf %66, %67 : vector<1x128xf32>
    %cst_31 = arith.constant 9.99999974E-6 : f32
    %69 = vector.broadcast %cst_31 : f32 to vector<1x128xf32>
    %70 = arith.addf %68, %69 : vector<1x128xf32>
    %71 = math.rsqrt %70 : vector<1x128xf32>
    %72 = vector.broadcast %71 : vector<1x128xf32> to vector<16x128xf32>
    %73 = arith.mulf %63, %72 : vector<16x128xf32>
    %cst_32 = arith.constant 0.000000e+00 : f32
    %74 = vector.broadcast %cst_32 : f32 to vector<16x128xf32>
    %75 = arith.subf %73, %74 : vector<16x128xf32>
    %cst_33 = arith.constant 5.000000e-01 : f32
    %76 = vector.broadcast %cst_33 : f32 to vector<16x128xf32>
    %77 = arith.mulf %75, %76 : vector<16x128xf32>
    %78 = arith.addf %74, %77 : vector<16x128xf32>
    %cst_34 = arith.constant 1.000000e+00 : f32
    %79 = vector.broadcast %cst_34 : f32 to vector<16x128xf32>
    %80 = arith.cmpf oge, %78, %79 : vector<16x128xf32>
    %81 = arith.extui %80 : vector<16x128xi1> to vector<16x128xi32>
    %82 = arith.sitofp %81 : vector<16x128xi32> to vector<16x128xf32>
    %83 = arith.truncf %82 : vector<16x128xf32> to vector<16x128xbf16>
    %cst_35 = arith.constant 1.000000e+00 : f32
    %84 = vector.broadcast %cst_35 : f32 to vector<16x128xf32>
    %85 = arith.subf %84, %82 : vector<16x128xf32>
    %86 = arith.mulf %78, %85 : vector<16x128xf32>
    %87 = arith.subf %73, %86 : vector<16x128xf32>
    %cst_36 = arith.constant 5.000000e-01 : f32
    %88 = vector.broadcast %cst_36 : f32 to vector<16x128xf32>
    %89 = arith.mulf %87, %88 : vector<16x128xf32>
    %90 = arith.addf %86, %89 : vector<16x128xf32>
    %cst_37 = arith.constant 1.000000e+00 : f32
    %91 = vector.broadcast %cst_37 : f32 to vector<16x128xf32>
    %92 = arith.cmpf oge, %90, %91 : vector<16x128xf32>
    %93 = arith.extui %92 : vector<16x128xi1> to vector<16x128xi32>
    %94 = arith.sitofp %93 : vector<16x128xi32> to vector<16x128xf32>
    %95 = arith.truncf %94 : vector<16x128xf32> to vector<16x128xbf16>
    %cst_38 = arith.constant 1.000000e+00 : f32
    %96 = vector.broadcast %cst_38 : f32 to vector<16x128xf32>
    %97 = arith.subf %96, %94 : vector<16x128xf32>
    %98 = arith.mulf %90, %97 : vector<16x128xf32>
    %99 = arith.subf %73, %98 : vector<16x128xf32>
    %cst_39 = arith.constant 5.000000e-01 : f32
    %100 = vector.broadcast %cst_39 : f32 to vector<16x128xf32>
    %101 = arith.mulf %99, %100 : vector<16x128xf32>
    %102 = arith.addf %98, %101 : vector<16x128xf32>
    %cst_40 = arith.constant 1.000000e+00 : f32
    %103 = vector.broadcast %cst_40 : f32 to vector<16x128xf32>
    %104 = arith.cmpf oge, %102, %103 : vector<16x128xf32>
    %105 = arith.extui %104 : vector<16x128xi1> to vector<16x128xi32>
    %106 = arith.sitofp %105 : vector<16x128xi32> to vector<16x128xf32>
    %107 = arith.truncf %106 : vector<16x128xf32> to vector<16x128xbf16>
    %cst_41 = arith.constant 1.000000e+00 : f32
    %108 = vector.broadcast %cst_41 : f32 to vector<16x128xf32>
    %109 = arith.subf %108, %106 : vector<16x128xf32>
    %110 = arith.mulf %102, %109 : vector<16x128xf32>
    %111 = arith.subf %73, %110 : vector<16x128xf32>
    %cst_42 = arith.constant 5.000000e-01 : f32
    %112 = vector.broadcast %cst_42 : f32 to vector<16x128xf32>
    %113 = arith.mulf %111, %112 : vector<16x128xf32>
    %114 = arith.addf %110, %113 : vector<16x128xf32>
    %cst_43 = arith.constant 1.000000e+00 : f32
    %115 = vector.broadcast %cst_43 : f32 to vector<16x128xf32>
    %116 = arith.cmpf oge, %114, %115 : vector<16x128xf32>
    %117 = arith.extui %116 : vector<16x128xi1> to vector<16x128xi32>
    %118 = arith.sitofp %117 : vector<16x128xi32> to vector<16x128xf32>
    %119 = arith.truncf %118 : vector<16x128xf32> to vector<16x128xbf16>
    %120 = tpu.concatenate %83, %95, %107, %119 in 0 : vector<16x128xbf16>, vector<16x128xbf16>, vector<16x128xbf16>, vector<16x128xbf16> -> vector<64x128xbf16>
    %c0_44 = arith.constant 0 : index
    %c0_45 = arith.constant 0 : index
    %c0_46 = arith.constant 0 : index
    %121 = vector.load %arg8[%c0_44, %c0_45, %c0_46] : memref<1x128x32xbf16, #tpu.memory_space<vmem>>, vector<1x128x32xbf16>
    %122 = vector.shape_cast %121 : vector<1x128x32xbf16> to vector<128x32xbf16>
    %cst_47 = arith.constant dense<0.000000e+00> : vector<64x32xf32>
    %123 = tpu.matmul %120, %122, %cst_47 {dimension_numbers = #tpu.dot_dimension_numbers<[1], [0], [0], [1], [0, 0, 1, 1], [], []>} : vector<64x128xbf16>, vector<128x32xbf16>, vector<64x32xf32> -> vector<64x32xf32>
    %c0_48 = arith.constant 0 : index
    %c0_49 = arith.constant 0 : index
    %c0_50 = arith.constant 0 : index
    %124 = vector.load %arg9[%c0_48, %c0_49, %c0_50] : memref<1x1x32xf32, #tpu.memory_space<vmem>>, vector<1x1x32xf32>
    %125 = vector.shape_cast %124 : vector<1x1x32xf32> to vector<1x32xf32>
    %126 = vector.broadcast %125 : vector<1x32xf32> to vector<64x32xf32>
    %127 = arith.addf %123, %126 : vector<64x32xf32>
    %128 = vector.shape_cast %127 : vector<64x32xf32> to vector<4x16x32xf32>
    %129 = vector.shape_cast %49 : vector<16x32xf32> to vector<1x16x32xf32>
    %130 = vector.broadcast %129 : vector<1x16x32xf32> to vector<4x16x32xf32>
    %131 = arith.addf %128, %130 : vector<4x16x32xf32>
    %132 = vector.shape_cast %131 : vector<4x16x32xf32> to vector<64x32xf32>
    %cst_51 = arith.constant dense<0.000000e+00> : vector<32xf32>
    %133 = vector.multi_reduction <add>, %132, %cst_51 [0] : vector<64x32xf32> to vector<32xf32>
    %134 = vector.shape_cast %133 : vector<32xf32> to vector<1x32xf32>
    %cst_52 = arith.constant 1.562500e-02 : f32
    %135 = vector.broadcast %cst_52 : f32 to vector<1x32xf32>
    %136 = arith.mulf %134, %135 : vector<1x32xf32>
    %137 = vector.broadcast %136 : vector<1x32xf32> to vector<64x32xf32>
    %138 = arith.subf %132, %137 : vector<64x32xf32>
    %139 = arith.mulf %138, %138 : vector<64x32xf32>
    %cst_53 = arith.constant dense<0.000000e+00> : vector<32xf32>
    %140 = vector.multi_reduction <add>, %139, %cst_53 [0] : vector<64x32xf32> to vector<32xf32>
    %141 = vector.shape_cast %140 : vector<32xf32> to vector<1x32xf32>
    %cst_54 = arith.constant 1.562500e-02 : f32
    %142 = vector.broadcast %cst_54 : f32 to vector<1x32xf32>
    %143 = arith.mulf %141, %142 : vector<1x32xf32>
    %cst_55 = arith.constant 9.99999974E-6 : f32
    %144 = vector.broadcast %cst_55 : f32 to vector<1x32xf32>
    %145 = arith.addf %143, %144 : vector<1x32xf32>
    %146 = math.rsqrt %145 : vector<1x32xf32>
    %cst_56 = arith.constant 0.000000e+00 : f32
    %147 = vector.broadcast %cst_56 : f32 to vector<16x32xf32>
    %cst_57 = arith.constant 0.000000e+00 : f32
    %148 = vector.broadcast %cst_57 : f32 to vector<16x32xf32>
    %149 = vector.extract_strided_slice %131 {offsets = [0, 0, 0], sizes = [1, 16, 32], strides = [1, 1, 1]} : vector<4x16x32xf32> to vector<1x16x32xf32>
    %150 = vector.shape_cast %149 : vector<1x16x32xf32> to vector<16x32xf32>
    %151 = vector.broadcast %136 : vector<1x32xf32> to vector<16x32xf32>
    %152 = arith.subf %150, %151 : vector<16x32xf32>
    %153 = vector.broadcast %146 : vector<1x32xf32> to vector<16x32xf32>
    %154 = arith.mulf %152, %153 : vector<16x32xf32>
    %155 = arith.subf %154, %147 : vector<16x32xf32>
    %cst_58 = arith.constant 5.000000e-01 : f32
    %156 = vector.broadcast %cst_58 : f32 to vector<16x32xf32>
    %157 = arith.mulf %155, %156 : vector<16x32xf32>
    %158 = arith.addf %147, %157 : vector<16x32xf32>
    %cst_59 = arith.constant 1.000000e+00 : f32
    %159 = vector.broadcast %cst_59 : f32 to vector<16x32xf32>
    %160 = arith.cmpf oge, %158, %159 : vector<16x32xf32>
    %161 = arith.extui %160 : vector<16x32xi1> to vector<16x32xi32>
    %162 = arith.sitofp %161 : vector<16x32xi32> to vector<16x32xf32>
    %163 = arith.addf %148, %162 : vector<16x32xf32>
    %cst_60 = arith.constant 1.000000e+00 : f32
    %164 = vector.broadcast %cst_60 : f32 to vector<16x32xf32>
    %165 = arith.subf %164, %162 : vector<16x32xf32>
    %166 = arith.mulf %158, %165 : vector<16x32xf32>
    %167 = vector.extract_strided_slice %131 {offsets = [1, 0, 0], sizes = [1, 16, 32], strides = [1, 1, 1]} : vector<4x16x32xf32> to vector<1x16x32xf32>
    %168 = vector.shape_cast %167 : vector<1x16x32xf32> to vector<16x32xf32>
    %169 = vector.broadcast %136 : vector<1x32xf32> to vector<16x32xf32>
    %170 = arith.subf %168, %169 : vector<16x32xf32>
    %171 = vector.broadcast %146 : vector<1x32xf32> to vector<16x32xf32>
    %172 = arith.mulf %170, %171 : vector<16x32xf32>
    %173 = arith.subf %172, %166 : vector<16x32xf32>
    %cst_61 = arith.constant 5.000000e-01 : f32
    %174 = vector.broadcast %cst_61 : f32 to vector<16x32xf32>
    %175 = arith.mulf %173, %174 : vector<16x32xf32>
    %176 = arith.addf %166, %175 : vector<16x32xf32>
    %cst_62 = arith.constant 1.000000e+00 : f32
    %177 = vector.broadcast %cst_62 : f32 to vector<16x32xf32>
    %178 = arith.cmpf oge, %176, %177 : vector<16x32xf32>
    %179 = arith.extui %178 : vector<16x32xi1> to vector<16x32xi32>
    %180 = arith.sitofp %179 : vector<16x32xi32> to vector<16x32xf32>
    %181 = arith.addf %163, %180 : vector<16x32xf32>
    %cst_63 = arith.constant 1.000000e+00 : f32
    %182 = vector.broadcast %cst_63 : f32 to vector<16x32xf32>
    %183 = arith.subf %182, %180 : vector<16x32xf32>
    %184 = arith.mulf %176, %183 : vector<16x32xf32>
    %185 = vector.extract_strided_slice %131 {offsets = [2, 0, 0], sizes = [1, 16, 32], strides = [1, 1, 1]} : vector<4x16x32xf32> to vector<1x16x32xf32>
    %186 = vector.shape_cast %185 : vector<1x16x32xf32> to vector<16x32xf32>
    %187 = vector.broadcast %136 : vector<1x32xf32> to vector<16x32xf32>
    %188 = arith.subf %186, %187 : vector<16x32xf32>
    %189 = vector.broadcast %146 : vector<1x32xf32> to vector<16x32xf32>
    %190 = arith.mulf %188, %189 : vector<16x32xf32>
    %191 = arith.subf %190, %184 : vector<16x32xf32>
    %cst_64 = arith.constant 5.000000e-01 : f32
    %192 = vector.broadcast %cst_64 : f32 to vector<16x32xf32>
    %193 = arith.mulf %191, %192 : vector<16x32xf32>
    %194 = arith.addf %184, %193 : vector<16x32xf32>
    %cst_65 = arith.constant 1.000000e+00 : f32
    %195 = vector.broadcast %cst_65 : f32 to vector<16x32xf32>
    %196 = arith.cmpf oge, %194, %195 : vector<16x32xf32>
    %197 = arith.extui %196 : vector<16x32xi1> to vector<16x32xi32>
    %198 = arith.sitofp %197 : vector<16x32xi32> to vector<16x32xf32>
    %199 = arith.addf %181, %198 : vector<16x32xf32>
    %cst_66 = arith.constant 1.000000e+00 : f32
    %200 = vector.broadcast %cst_66 : f32 to vector<16x32xf32>
    %201 = arith.subf %200, %198 : vector<16x32xf32>
    %202 = arith.mulf %194, %201 : vector<16x32xf32>
    %203 = vector.extract_strided_slice %131 {offsets = [3, 0, 0], sizes = [1, 16, 32], strides = [1, 1, 1]} : vector<4x16x32xf32> to vector<1x16x32xf32>
    %204 = vector.shape_cast %203 : vector<1x16x32xf32> to vector<16x32xf32>
    %205 = vector.broadcast %136 : vector<1x32xf32> to vector<16x32xf32>
    %206 = arith.subf %204, %205 : vector<16x32xf32>
    %207 = vector.broadcast %146 : vector<1x32xf32> to vector<16x32xf32>
    %208 = arith.mulf %206, %207 : vector<16x32xf32>
    %209 = arith.subf %208, %202 : vector<16x32xf32>
    %cst_67 = arith.constant 5.000000e-01 : f32
    %210 = vector.broadcast %cst_67 : f32 to vector<16x32xf32>
    %211 = arith.mulf %209, %210 : vector<16x32xf32>
    %212 = arith.addf %202, %211 : vector<16x32xf32>
    %cst_68 = arith.constant 1.000000e+00 : f32
    %213 = vector.broadcast %cst_68 : f32 to vector<16x32xf32>
    %214 = arith.cmpf oge, %212, %213 : vector<16x32xf32>
    %215 = arith.extui %214 : vector<16x32xi1> to vector<16x32xi32>
    %216 = arith.sitofp %215 : vector<16x32xi32> to vector<16x32xf32>
    %217 = arith.addf %199, %216 : vector<16x32xf32>
    %cst_69 = arith.constant 2.500000e-01 : f32
    %218 = vector.broadcast %cst_69 : f32 to vector<16x32xf32>
    %219 = arith.mulf %217, %218 : vector<16x32xf32>
    %cst_70 = arith.constant dense<0.000000e+00> : vector<32xf32>
    %220 = vector.multi_reduction <add>, %219, %cst_70 [0] : vector<16x32xf32> to vector<32xf32>
    %221 = vector.shape_cast %220 : vector<32xf32> to vector<1x32xf32>
    %cst_71 = arith.constant 6.250000e-02 : f32
    %222 = vector.broadcast %cst_71 : f32 to vector<1x32xf32>
    %223 = arith.mulf %221, %222 : vector<1x32xf32>
    %224 = vector.broadcast %223 : vector<1x32xf32> to vector<16x32xf32>
    %225 = arith.subf %219, %224 : vector<16x32xf32>
    %226 = arith.mulf %225, %225 : vector<16x32xf32>
    %cst_72 = arith.constant dense<0.000000e+00> : vector<32xf32>
    %227 = vector.multi_reduction <add>, %226, %cst_72 [0] : vector<16x32xf32> to vector<32xf32>
    %228 = vector.shape_cast %227 : vector<32xf32> to vector<1x32xf32>
    %cst_73 = arith.constant 6.250000e-02 : f32
    %229 = vector.broadcast %cst_73 : f32 to vector<1x32xf32>
    %230 = arith.mulf %228, %229 : vector<1x32xf32>
    %cst_74 = arith.constant 9.99999974E-6 : f32
    %231 = vector.broadcast %cst_74 : f32 to vector<1x32xf32>
    %232 = arith.addf %230, %231 : vector<1x32xf32>
    %233 = math.rsqrt %232 : vector<1x32xf32>
    %234 = vector.broadcast %233 : vector<1x32xf32> to vector<16x32xf32>
    %235 = arith.mulf %225, %234 : vector<16x32xf32>
    %c0_75 = arith.constant 0 : index
    %c0_76 = arith.constant 0 : index
    %236 = vector.load %arg11[%c0_75, %c0_76] : memref<16x32xf32, #tpu.memory_space<vmem>>, vector<16x32xf32>
    tpu.vector_store %arg11[%c0_75, %c0_76], %235 {strides = array<i32>} : memref<16x32xf32, #tpu.memory_space<vmem>>, vector<16x32xf32>,
    %c0_77 = arith.constant 0 : index
    %c0_78 = arith.constant 0 : index
    %c0_79 = arith.constant 0 : index
    %237 = vector.load %arg10[%c0_77, %c0_78, %c0_79] : memref<1x16x32xf32, #tpu.memory_space<vmem>>, vector<1x16x32xf32>
    %238 = vector.shape_cast %237 : vector<1x16x32xf32> to vector<16x32xf32>
    %239 = vector.shape_cast %235 : vector<16x32xf32> to vector<1x16x32xf32>
    tpu.vector_store %arg10[%c0_77, %c0_78, %c0_79], %239 {strides = array<i32>} : memref<1x16x32xf32, #tpu.memory_space<vmem>>, vector<1x16x32xf32>,
    return
  }
  func.func @transform_0(%arg0: i32) -> (i32, i32) {
    %c0_i32 = arith.constant 0 : i32
    %c0_i32_0 = arith.constant 0 : i32
    %c0_i32_1 = arith.constant 0 : i32
    return %c0_i32, %c0_i32_0 : i32, i32
  }
  func.func @transform_1(%arg0: i32) -> (i32, i32, i32) {
    %c0_i32 = arith.constant 0 : i32
    %c0_i32_0 = arith.constant 0 : i32
    %c0_i32_1 = arith.constant 0 : i32
    %c0_i32_2 = arith.constant 0 : i32
    return %c0_i32, %c0_i32_0, %c0_i32_1 : i32, i32, i32
  }
  func.func @transform_2(%arg0: i32) -> (i32, i32, i32) {
    %c0_i32 = arith.constant 0 : i32
    %c0_i32_0 = arith.constant 0 : i32
    %c0_i32_1 = arith.constant 0 : i32
    %c0_i32_2 = arith.constant 0 : i32
    return %c0_i32, %c0_i32_0, %c0_i32_1 : i32, i32, i32
  }
  func.func @transform_3(%arg0: i32) -> (i32, i32, i32) {
    %c0_i32 = arith.constant 0 : i32
    %c0_i32_0 = arith.constant 0 : i32
    %c0_i32_1 = arith.constant 0 : i32
    return %arg0, %c0_i32, %c0_i32_0 : i32, i32, i32
  }
  func.func @transform_4(%arg0: i32) -> (i32, i32, i32) {
    %c0_i32 = arith.constant 0 : i32
    %c0_i32_0 = arith.constant 0 : i32
    %c0_i32_1 = arith.constant 0 : i32
    return %arg0, %c0_i32, %c0_i32_0 : i32, i32, i32
  }
  func.func @transform_5(%arg0: i32) -> (i32, i32, i32) {
    %c0_i32 = arith.constant 0 : i32
    %c0_i32_0 = arith.constant 0 : i32
    %c0_i32_1 = arith.constant 0 : i32
    return %arg0, %c0_i32, %c0_i32_0 : i32, i32, i32
  }
  func.func @transform_6(%arg0: i32) -> (i32, i32, i32) {
    %c0_i32 = arith.constant 0 : i32
    %c0_i32_0 = arith.constant 0 : i32
    %c0_i32_1 = arith.constant 0 : i32
    return %arg0, %c0_i32, %c0_i32_0 : i32, i32, i32
  }
  func.func @transform_7(%arg0: i32) -> (i32, i32, i32) {
    %c0_i32 = arith.constant 0 : i32
    %c0_i32_0 = arith.constant 0 : i32
    %c0_i32_1 = arith.constant 0 : i32
    return %arg0, %c0_i32, %c0_i32_0 : i32, i32, i32
  }
  func.func @transform_8(%arg0: i32) -> (i32, i32, i32) {
    %c0_i32 = arith.constant 0 : i32
    %c0_i32_0 = arith.constant 0 : i32
    %c0_i32_1 = arith.constant 0 : i32
    return %arg0, %c0_i32, %c0_i32_0 : i32, i32, i32
  }
  func.func @transform_9(%arg0: i32) -> (i32, i32, i32) {
    %c0_i32 = arith.constant 0 : i32
    %c0_i32_0 = arith.constant 0 : i32
    %c0_i32_1 = arith.constant 0 : i32
    return %arg0, %c0_i32, %c0_i32_0 : i32, i32, i32
  }
}

module attributes {stable_mosaic.version = 11 : i64} {
  func.func @encoder_kernel(%arg0: i32, %arg1: memref<16x32xf32, #tpu.memory_space<vmem>>, %arg2: memref<2x16x8xbf16, #tpu.memory_space<vmem>>, %arg3: memref<2x8x16xbf16, #tpu.memory_space<vmem>>, %arg4: memref<1x8x32xf32, #tpu.memory_space<vmem>>, %arg5: memref<1x8x32xf32, #tpu.memory_space<vmem>>, %arg6: memref<1x32x128xbf16, #tpu.memory_space<vmem>>, %arg7: memref<1x1x128xf32, #tpu.memory_space<vmem>>, %arg8: memref<1x128x32xbf16, #tpu.memory_space<vmem>>, %arg9: memref<1x1x32xf32, #tpu.memory_space<vmem>>, %arg10: memref<1x16x32xf32, #tpu.memory_space<vmem>>, %arg11: memref<16x32xf32, #tpu.memory_space<vmem>>) attributes {dimension_semantics = [#tpu.dimension_semantics<arbitrary>], iteration_bounds = array<i64: 2>, scalar_prefetch = 0 : i64, scratch_operands = 1 : i64, tpu.core_type = #tpu.core_type<tc>, window_params = [{pipeline_mode = #tpu.pipeline_mode<synchronous>, transform_indices = @transform_0, window_bounds = array<i64: 16, 32>}, {pipeline_mode = #tpu.pipeline_mode<synchronous>, transform_indices = @transform_1, window_bounds = array<i64: 2, 16, 8>}, {pipeline_mode = #tpu.pipeline_mode<synchronous>, transform_indices = @transform_2, window_bounds = array<i64: 2, 8, 16>}, {transform_indices = @transform_3, window_bounds = array<i64: 1, 8, 32>}, {transform_indices = @transform_4, window_bounds = array<i64: 1, 8, 32>}, {transform_indices = @transform_5, window_bounds = array<i64: 1, 32, 128>}, {transform_indices = @transform_6, window_bounds = array<i64: 1, 1, 128>}, {transform_indices = @transform_7, window_bounds = array<i64: 1, 128, 32>}, {transform_indices = @transform_8, window_bounds = array<i64: 1, 1, 32>}, {transform_indices = @transform_9, window_bounds = array<i64: 1, 16, 32>}]} {
    %c0_i32 = arith.constant 0 : i32
    %0 = arith.cmpi eq, %arg0, %c0_i32 : i32
    %1 = arith.extui %0 : i1 to i32
    %c0_i32_0 = arith.constant 0 : i32
    %2 = arith.cmpi ne, %1, %c0_i32_0 : i32
    scf.if %2 {
      %c0_80 = arith.constant 0 : index
      %c0_81 = arith.constant 0 : index
      %240 = vector.load %arg1[%c0_80, %c0_81] : memref<16x32xf32, #tpu.memory_space<vmem>>, vector<16x32xf32>
      %c0_82 = arith.constant 0 : index
      %c0_83 = arith.constant 0 : index
      %241 = vector.load %arg11[%c0_82, %c0_83] : memref<16x32xf32, #tpu.memory_space<vmem>>, vector<16x32xf32>
      tpu.vector_store %arg11[%c0_82, %c0_83], %240 {strides = array<i32>} : memref<16x32xf32, #tpu.memory_space<vmem>>, vector<16x32xf32>,
    } else {
    }
    %c0 = arith.constant 0 : index
    %c0_1 = arith.constant 0 : index
    %3 = vector.load %arg11[%c0, %c0_1] : memref<16x32xf32, #tpu.memory_space<vmem>>, vector<16x32xf32>
    %4 = vector.shape_cast %3 : vector<16x32xf32> to vector<2x8x32xf32>
    %c0_2 = arith.constant 0 : index
    %c0_3 = arith.constant 0 : index
    %c0_4 = arith.constant 0 : index
    %5 = vector.load %arg2[%c0_2, %c0_3, %c0_4] : memref<2x16x8xbf16, #tpu.memory_space<vmem>>, vector<2x16x8xbf16>
    %6 = arith.truncf %4 : vector<2x8x32xf32> to vector<2x8x32xbf16>
    "tpu.trace_start"() <{level = 10 : i32, message = "bfs,bsh->bfh"}> : () -> ()
    %cst = arith.constant dense<0.000000e+00> : vector<2x16x32xf32>
    %7 = tpu.matmul %5, %6, %cst {dimension_numbers = #tpu.dot_dimension_numbers<[2], [1], [1], [2], [0, 0, 0, 1, 1, 2], [0], [0]>} : vector<2x16x8xbf16>, vector<2x8x32xbf16>, vector<2x16x32xf32> -> vector<2x16x32xf32>
    "tpu.trace_stop"() : () -> ()
    %c0_5 = arith.constant 0 : index
    %c0_6 = arith.constant 0 : index
    %c0_7 = arith.constant 0 : index
    %8 = vector.load %arg4[%c0_5, %c0_6, %c0_7] : memref<1x8x32xf32, #tpu.memory_space<vmem>>, vector<1x8x32xf32>
    %9 = vector.shape_cast %8 : vector<1x8x32xf32> to vector<8x32xf32>
    %c0_8 = arith.constant 0 : index
    %c0_9 = arith.constant 0 : index
    %c0_10 = arith.constant 0 : index
    %10 = vector.load %arg5[%c0_8, %c0_9, %c0_10] : memref<1x8x32xf32, #tpu.memory_space<vmem>>, vector<1x8x32xf32>
    %11 = vector.shape_cast %10 : vector<1x8x32xf32> to vector<8x32xf32>
    %12 = vector.extract_strided_slice %7 {offsets = [0, 0, 0], sizes = [2, 8, 32], strides = [1, 1, 1]} : vector<2x16x32xf32> to vector<2x8x32xf32>
    %13 = vector.extract_strided_slice %7 {offsets = [0, 8, 0], sizes = [2, 8, 32], strides = [1, 1, 1]} : vector<2x16x32xf32> to vector<2x8x32xf32>
    %14 = vector.shape_cast %9 : vector<8x32xf32> to vector<1x8x32xf32>
    %15 = vector.broadcast %14 : vector<1x8x32xf32> to vector<2x8x32xf32>
    %16 = arith.mulf %12, %15 : vector<2x8x32xf32>
    %17 = vector.shape_cast %11 : vector<8x32xf32> to vector<1x8x32xf32>
    %18 = vector.broadcast %17 : vector<1x8x32xf32> to vector<2x8x32xf32>
    %19 = arith.mulf %13, %18 : vector<2x8x32xf32>
    %20 = arith.subf %16, %19 : vector<2x8x32xf32>
    %21 = vector.shape_cast %11 : vector<8x32xf32> to vector<1x8x32xf32>
    %22 = vector.broadcast %21 : vector<1x8x32xf32> to vector<2x8x32xf32>
    %23 = arith.mulf %12, %22 : vector<2x8x32xf32>
    %24 = vector.shape_cast %9 : vector<8x32xf32> to vector<1x8x32xf32>
    %25 = vector.broadcast %24 : vector<1x8x32xf32> to vector<2x8x32xf32>
    %26 = arith.mulf %13, %25 : vector<2x8x32xf32>
    %27 = arith.addf %23, %26 : vector<2x8x32xf32>
    %28 = tpu.concatenate %20, %27 in 1 : vector<2x8x32xf32>, vector<2x8x32xf32> -> vector<2x16x32xf32>
    %c0_11 = arith.constant 0 : index
    %c0_12 = arith.constant 0 : index
    %c0_13 = arith.constant 0 : index
    %29 = vector.load %arg3[%c0_11, %c0_12, %c0_13] : memref<2x8x16xbf16, #tpu.memory_space<vmem>>, vector<2x8x16xbf16>
    %30 = arith.truncf %28 : vector<2x16x32xf32> to vector<2x16x32xbf16>
    "tpu.trace_start"() <{level = 10 : i32, message = "bsf,bfh->bsh"}> : () -> ()
    %cst_14 = arith.constant dense<0.000000e+00> : vector<2x8x32xf32>
    %31 = tpu.matmul %29, %30, %cst_14 {dimension_numbers = #tpu.dot_dimension_numbers<[2], [1], [1], [2], [0, 0, 0, 1, 1, 2], [0], [0]>} : vector<2x8x16xbf16>, vector<2x16x32xbf16>, vector<2x8x32xf32> -> vector<2x8x32xf32>
    "tpu.trace_stop"() : () -> ()
    %32 = vector.shape_cast %31 : vector<2x8x32xf32> to vector<16x32xf32>
    %33 = arith.addf %32, %3 : vector<16x32xf32>
    %cst_15 = arith.constant dense<0.000000e+00> : vector<32xf32>
    %34 = vector.multi_reduction <add>, %33, %cst_15 [0] : vector<16x32xf32> to vector<32xf32>
    %35 = vector.shape_cast %34 : vector<32xf32> to vector<1x32xf32>
    %cst_16 = arith.constant 6.250000e-02 : f32
    %36 = vector.broadcast %cst_16 : f32 to vector<1x32xf32>
    %37 = arith.mulf %35, %36 : vector<1x32xf32>
    %38 = vector.broadcast %37 : vector<1x32xf32> to vector<16x32xf32>
    %39 = arith.subf %33, %38 : vector<16x32xf32>
    %40 = arith.mulf %39, %39 : vector<16x32xf32>
    %cst_17 = arith.constant dense<0.000000e+00> : vector<32xf32>
    %41 = vector.multi_reduction <add>, %40, %cst_17 [0] : vector<16x32xf32> to vector<32xf32>
    %42 = vector.shape_cast %41 : vector<32xf32> to vector<1x32xf32>
    %cst_18 = arith.constant 6.250000e-02 : f32
    %43 = vector.broadcast %cst_18 : f32 to vector<1x32xf32>
    %44 = arith.mulf %42, %43 : vector<1x32xf32>
    %cst_19 = arith.constant 9.99999974E-6 : f32
    %45 = vector.broadcast %cst_19 : f32 to vector<1x32xf32>
    %46 = arith.addf %44, %45 : vector<1x32xf32>
    %47 = math.rsqrt %46 : vector<1x32xf32>
    %48 = vector.broadcast %47 : vector<1x32xf32> to vector<16x32xf32>
    %49 = arith.mulf %39, %48 : vector<16x32xf32>
    %50 = arith.truncf %49 : vector<16x32xf32> to vector<16x32xbf16>
    %c0_20 = arith.constant 0 : index
    %c0_21 = arith.constant 0 : index
    %c0_22 = arith.constant 0 : index
    %51 = vector.load %arg6[%c0_20, %c0_21, %c0_22] : memref<1x32x128xbf16, #tpu.memory_space<vmem>>, vector<1x32x128xbf16>
    %52 = vector.shape_cast %51 : vector<1x32x128xbf16> to vector<32x128xbf16>
    %cst_23 = arith.constant dense<0.000000e+00> : vector<16x128xf32>
    %53 = tpu.matmul %50, %52, %cst_23 {dimension_numbers = #tpu.dot_dimension_numbers<[1], [0], [0], [1], [0, 0, 1, 1], [], []>} : vector<16x32xbf16>, vector<32x128xbf16>, vector<16x128xf32> -> vector<16x128xf32>
    %c0_24 = arith.constant 0 : index
    %c0_25 = arith.constant 0 : index
    %c0_26 = arith.constant 0 : index
    %54 = vector.load %arg7[%c0_24, %c0_25, %c0_26] : memref<1x1x128xf32, #tpu.memory_space<vmem>>, vector<1x1x128xf32>
    %55 = vector.shape_cast %54 : vector<1x1x128xf32> to vector<1x128xf32>
    %56 = vector.broadcast %55 : vector<1x128xf32> to vector<16x128xf32>
    %57 = arith.addf %53, %56 : vector<16x128xf32>
    %cst_27 = arith.constant dense<0.000000e+00> : vector<128xf32>
    %58 = vector.multi_reduction <add>, %57, %cst_27 [0] : vector<16x128xf32> to vector<128xf32>
    %59 = vector.shape_cast %58 : vector<128xf32> to vector<1x128xf32>
    %cst_28 = arith.constant 6.250000e-02 : f32
    %60 = vector.broadcast %cst_28 : f32 to vector<1x128xf32>
    %61 = arith.mulf %59, %60 : vector<1x128xf32>
    %62 = vector.broadcast %61 : vector<1x128xf32> to vector<16x128xf32>
    %63 = arith.subf %57, %62 : vector<16x128xf32>
    %64 = arith.mulf %63, %63 : vector<16x128xf32>
    %cst_29 = arith.constant dense<0.000000e+00> : vector<128xf32>
    %65 = vector.multi_reduction <add>, %64, %cst_29 [0] : vector<16x128xf32> to vector<128xf32>
    %66 = vector.shape_cast %65 : vector<128xf32> to vector<1x128xf32>
    %cst_30 = arith.constant 6.250000e-02 : f32
    %67 = vector.broadcast %cst_30 : f32 to vector<1x128xf32>
    %68 = arith.mulf %66, %67 : vector<1x128xf32>
    %cst_31 = arith.constant 9.99999974E-6 : f32
    %69 = vector.broadcast %cst_31 : f32 to vector<1x128xf32>
    %70 = arith.addf %68, %69 : vector<1x128xf32>
    %71 = math.rsqrt %70 : vector<1x128xf32>
    %72 = vector.broadcast %71 : vector<1x128xf32> to vector<16x128xf32>
    %73 = arith.mulf %63, %72 : vector<16x128xf32>
    %cst_32 = arith.constant 0.000000e+00 : f32
    %74 = vector.broadcast %cst_32 : f32 to vector<16x128xf32>
    %75 = arith.subf %73, %74 : vector<16x128xf32>
    %cst_33 = arith.constant 5.000000e-01 : f32
    %76 = vector.broadcast %cst_33 : f32 to vector<16x128xf32>
    %77 = arith.mulf %75, %76 : vector<16x128xf32>
    %78 = arith.addf %74, %77 : vector<16x128xf32>
    %cst_34 = arith.constant 1.000000e+00 : f32
    %79 = vector.broadcast %cst_34 : f32 to vector<16x128xf32>
    %80 = arith.cmpf oge, %78, %79 : vector<16x128xf32>
    %81 = arith.extui %80 : vector<16x128xi1> to vector<16x128xi32>
    %82 = arith.sitofp %81 : vector<16x128xi32> to vector<16x128xf32>
    %83 = arith.truncf %82 : vector<16x128xf32> to vector<16x128xbf16>
    %cst_35 = arith.constant 1.000000e+00 : f32
    %84 = vector.broadcast %cst_35 : f32 to vector<16x128xf32>
    %85 = arith.subf %84, %82 : vector<16x128xf32>
    %86 = arith.mulf %78, %85 : vector<16x128xf32>
    %87 = arith.subf %73, %86 : vector<16x128xf32>
    %cst_36 = arith.constant 5.000000e-01 : f32
    %88 = vector.broadcast %cst_36 : f32 to vector<16x128xf32>
    %89 = arith.mulf %87, %88 : vector<16x128xf32>
    %90 = arith.addf %86, %89 : vector<16x128xf32>
    %cst_37 = arith.constant 1.000000e+00 : f32
    %91 = vector.broadcast %cst_37 : f32 to vector<16x128xf32>
    %92 = arith.cmpf oge, %90, %91 : vector<16x128xf32>
    %93 = arith.extui %92 : vector<16x128xi1> to vector<16x128xi32>
    %94 = arith.sitofp %93 : vector<16x128xi32> to vector<16x128xf32>
    %95 = arith.truncf %94 : vector<16x128xf32> to vector<16x128xbf16>
    %cst_38 = arith.constant 1.000000e+00 : f32
    %96 = vector.broadcast %cst_38 : f32 to vector<16x128xf32>
    %97 = arith.subf %96, %94 : vector<16x128xf32>
    %98 = arith.mulf %90, %97 : vector<16x128xf32>
    %99 = arith.subf %73, %98 : vector<16x128xf32>
    %cst_39 = arith.constant 5.000000e-01 : f32
    %100 = vector.broadcast %cst_39 : f32 to vector<16x128xf32>
    %101 = arith.mulf %99, %100 : vector<16x128xf32>
    %102 = arith.addf %98, %101 : vector<16x128xf32>
    %cst_40 = arith.constant 1.000000e+00 : f32
    %103 = vector.broadcast %cst_40 : f32 to vector<16x128xf32>
    %104 = arith.cmpf oge, %102, %103 : vector<16x128xf32>
    %105 = arith.extui %104 : vector<16x128xi1> to vector<16x128xi32>
    %106 = arith.sitofp %105 : vector<16x128xi32> to vector<16x128xf32>
    %107 = arith.truncf %106 : vector<16x128xf32> to vector<16x128xbf16>
    %cst_41 = arith.constant 1.000000e+00 : f32
    %108 = vector.broadcast %cst_41 : f32 to vector<16x128xf32>
    %109 = arith.subf %108, %106 : vector<16x128xf32>
    %110 = arith.mulf %102, %109 : vector<16x128xf32>
    %111 = arith.subf %73, %110 : vector<16x128xf32>
    %cst_42 = arith.constant 5.000000e-01 : f32
    %112 = vector.broadcast %cst_42 : f32 to vector<16x128xf32>
    %113 = arith.mulf %111, %112 : vector<16x128xf32>
    %114 = arith.addf %110, %113 : vector<16x128xf32>
    %cst_43 = arith.constant 1.000000e+00 : f32
    %115 = vector.broadcast %cst_43 : f32 to vector<16x128xf32>
    %116 = arith.cmpf oge, %114, %115 : vector<16x128xf32>
    %117 = arith.extui %116 : vector<16x128xi1> to vector<16x128xi32>
    %118 = arith.sitofp %117 : vector<16x128xi32> to vector<16x128xf32>
    %119 = arith.truncf %118 : vector<16x128xf32> to vector<16x128xbf16>
    %120 = tpu.concatenate %83, %95, %107, %119 in 0 : vector<16x128xbf16>, vector<16x128xbf16>, vector<16x128xbf16>, vector<16x128xbf16> -> vector<64x128xbf16>
    %c0_44 = arith.constant 0 : index
    %c0_45 = arith.constant 0 : index
    %c0_46 = arith.constant 0 : index
    %121 = vector.load %arg8[%c0_44, %c0_45, %c0_46] : memref<1x128x32xbf16, #tpu.memory_space<vmem>>, vector<1x128x32xbf16>
    %122 = vector.shape_cast %121 : vector<1x128x32xbf16> to vector<128x32xbf16>
    %cst_47 = arith.constant dense<0.000000e+00> : vector<64x32xf32>
    %123 = tpu.matmul %120, %122, %cst_47 {dimension_numbers = #tpu.dot_dimension_numbers<[1], [0], [0], [1], [0, 0, 1, 1], [], []>} : vector<64x128xbf16>, vector<128x32xbf16>, vector<64x32xf32> -> vector<64x32xf32>
    %c0_48 = arith.constant 0 : index
    %c0_49 = arith.constant 0 : index
    %c0_50 = arith.constant 0 : index
    %124 = vector.load %arg9[%c0_48, %c0_49, %c0_50] : memref<1x1x32xf32, #tpu.memory_space<vmem>>, vector<1x1x32xf32>
    %125 = vector.shape_cast %124 : vector<1x1x32xf32> to vector<1x32xf32>
    %126 = vector.broadcast %125 : vector<1x32xf32> to vector<64x32xf32>
    %127 = arith.addf %123, %126 : vector<64x32xf32>
    %128 = vector.shape_cast %127 : vector<64x32xf32> to vector<4x16x32xf32>
    %129 = vector.shape_cast %49 : vector<16x32xf32> to vector<1x16x32xf32>
    %130 = vector.broadcast %129 : vector<1x16x32xf32> to vector<4x16x32xf32>
    %131 = arith.addf %128, %130 : vector<4x16x32xf32>
    %132 = vector.shape_cast %131 : vector<4x16x32xf32> to vector<64x32xf32>
    %cst_51 = arith.constant dense<0.000000e+00> : vector<32xf32>
    %133 = vector.multi_reduction <add>, %132, %cst_51 [0] : vector<64x32xf32> to vector<32xf32>
    %134 = vector.shape_cast %133 : vector<32xf32> to vector<1x32xf32>
    %cst_52 = arith.constant 1.562500e-02 : f32
    %135 = vector.broadcast %cst_52 : f32 to vector<1x32xf32>
    %136 = arith.mulf %134, %135 : vector<1x32xf32>
    %137 = vector.broadcast %136 : vector<1x32xf32> to vector<64x32xf32>
    %138 = arith.subf %132, %137 : vector<64x32xf32>
    %139 = arith.mulf %138, %138 : vector<64x32xf32>
    %cst_53 = arith.constant dense<0.000000e+00> : vector<32xf32>
    %140 = vector.multi_reduction <add>, %139, %cst_53 [0] : vector<64x32xf32> to vector<32xf32>
    %141 = vector.shape_cast %140 : vector<32xf32> to vector<1x32xf32>
    %cst_54 = arith.constant 1.562500e-02 : f32
    %142 = vector.broadcast %cst_54 : f32 to vector<1x32xf32>
    %143 = arith.mulf %141, %142 : vector<1x32xf32>
    %cst_55 = arith.constant 9.99999974E-6 : f32
    %144 = vector.broadcast %cst_55 : f32 to vector<1x32xf32>
    %145 = arith.addf %143, %144 : vector<1x32xf32>
    %146 = math.rsqrt %145 : vector<1x32xf32>
    %cst_56 = arith.constant 0.000000e+00 : f32
    %147 = vector.broadcast %cst_56 : f32 to vector<16x32xf32>
    %cst_57 = arith.constant 0.000000e+00 : f32
    %148 = vector.broadcast %cst_57 : f32 to vector<16x32xf32>
    %149 = vector.extract_strided_slice %131 {offsets = [0, 0, 0], sizes = [1, 16, 32], strides = [1, 1, 1]} : vector<4x16x32xf32> to vector<1x16x32xf32>
    %150 = vector.shape_cast %149 : vector<1x16x32xf32> to vector<16x32xf32>
    %151 = vector.broadcast %136 : vector<1x32xf32> to vector<16x32xf32>
    %152 = arith.subf %150, %151 : vector<16x32xf32>
    %153 = vector.broadcast %146 : vector<1x32xf32> to vector<16x32xf32>
    %154 = arith.mulf %152, %153 : vector<16x32xf32>
    %155 = arith.subf %154, %147 : vector<16x32xf32>
    %cst_58 = arith.constant 5.000000e-01 : f32
    %156 = vector.broadcast %cst_58 : f32 to vector<16x32xf32>
    %157 = arith.mulf %155, %156 : vector<16x32xf32>
    %158 = arith.addf %147, %157 : vector<16x32xf32>
    %cst_59 = arith.constant 1.000000e+00 : f32
    %159 = vector.broadcast %cst_59 : f32 to vector<16x32xf32>
    %160 = arith.cmpf oge, %158, %159 : vector<16x32xf32>
    %161 = arith.extui %160 : vector<16x32xi1> to vector<16x32xi32>
    %162 = arith.sitofp %161 : vector<16x32xi32> to vector<16x32xf32>
    %163 = arith.addf %148, %162 : vector<16x32xf32>
    %cst_60 = arith.constant 1.000000e+00 : f32
    %164 = vector.broadcast %cst_60 : f32 to vector<16x32xf32>
    %165 = arith.subf %164, %162 : vector<16x32xf32>
    %166 = arith.mulf %158, %165 : vector<16x32xf32>
    %167 = vector.extract_strided_slice %131 {offsets = [1, 0, 0], sizes = [1, 16, 32], strides = [1, 1, 1]} : vector<4x16x32xf32> to vector<1x16x32xf32>
    %168 = vector.shape_cast %167 : vector<1x16x32xf32> to vector<16x32xf32>
    %169 = vector.broadcast %136 : vector<1x32xf32> to vector<16x32xf32>
    %170 = arith.subf %168, %169 : vector<16x32xf32>
    %171 = vector.broadcast %146 : vector<1x32xf32> to vector<16x32xf32>
    %172 = arith.mulf %170, %171 : vector<16x32xf32>
    %173 = arith.subf %172, %166 : vector<16x32xf32>
    %cst_61 = arith.constant 5.000000e-01 : f32
    %174 = vector.broadcast %cst_61 : f32 to vector<16x32xf32>
    %175 = arith.mulf %173, %174 : vector<16x32xf32>
    %176 = arith.addf %166, %175 : vector<16x32xf32>
    %cst_62 = arith.constant 1.000000e+00 : f32
    %177 = vector.broadcast %cst_62 : f32 to vector<16x32xf32>
    %178 = arith.cmpf oge, %176, %177 : vector<16x32xf32>
    %179 = arith.extui %178 : vector<16x32xi1> to vector<16x32xi32>
    %180 = arith.sitofp %179 : vector<16x32xi32> to vector<16x32xf32>
    %181 = arith.addf %163, %180 : vector<16x32xf32>
    %cst_63 = arith.constant 1.000000e+00 : f32
    %182 = vector.broadcast %cst_63 : f32 to vector<16x32xf32>
    %183 = arith.subf %182, %180 : vector<16x32xf32>
    %184 = arith.mulf %176, %183 : vector<16x32xf32>
    %185 = vector.extract_strided_slice %131 {offsets = [2, 0, 0], sizes = [1, 16, 32], strides = [1, 1, 1]} : vector<4x16x32xf32> to vector<1x16x32xf32>
    %186 = vector.shape_cast %185 : vector<1x16x32xf32> to vector<16x32xf32>
    %187 = vector.broadcast %136 : vector<1x32xf32> to vector<16x32xf32>
    %188 = arith.subf %186, %187 : vector<16x32xf32>
    %189 = vector.broadcast %146 : vector<1x32xf32> to vector<16x32xf32>
    %190 = arith.mulf %188, %189 : vector<16x32xf32>
    %191 = arith.subf %190, %184 : vector<16x32xf32>
    %cst_64 = arith.constant 5.000000e-01 : f32
    %192 = vector.broadcast %cst_64 : f32 to vector<16x32xf32>
    %193 = arith.mulf %191, %192 : vector<16x32xf32>
    %194 = arith.addf %184, %193 : vector<16x32xf32>
    %cst_65 = arith.constant 1.000000e+00 : f32
    %195 = vector.broadcast %cst_65 : f32 to vector<16x32xf32>
    %196 = arith.cmpf oge, %194, %195 : vector<16x32xf32>
    %197 = arith.extui %196 : vector<16x32xi1> to vector<16x32xi32>
    %198 = arith.sitofp %197 : vector<16x32xi32> to vector<16x32xf32>
    %199 = arith.addf %181, %198 : vector<16x32xf32>
    %cst_66 = arith.constant 1.000000e+00 : f32
    %200 = vector.broadcast %cst_66 : f32 to vector<16x32xf32>
    %201 = arith.subf %200, %198 : vector<16x32xf32>
    %202 = arith.mulf %194, %201 : vector<16x32xf32>
    %203 = vector.extract_strided_slice %131 {offsets = [3, 0, 0], sizes = [1, 16, 32], strides = [1, 1, 1]} : vector<4x16x32xf32> to vector<1x16x32xf32>
    %204 = vector.shape_cast %203 : vector<1x16x32xf32> to vector<16x32xf32>
    %205 = vector.broadcast %136 : vector<1x32xf32> to vector<16x32xf32>
    %206 = arith.subf %204, %205 : vector<16x32xf32>
    %207 = vector.broadcast %146 : vector<1x32xf32> to vector<16x32xf32>
    %208 = arith.mulf %206, %207 : vector<16x32xf32>
    %209 = arith.subf %208, %202 : vector<16x32xf32>
    %cst_67 = arith.constant 5.000000e-01 : f32
    %210 = vector.broadcast %cst_67 : f32 to vector<16x32xf32>
    %211 = arith.mulf %209, %210 : vector<16x32xf32>
    %212 = arith.addf %202, %211 : vector<16x32xf32>
    %cst_68 = arith.constant 1.000000e+00 : f32
    %213 = vector.broadcast %cst_68 : f32 to vector<16x32xf32>
    %214 = arith.cmpf oge, %212, %213 : vector<16x32xf32>
    %215 = arith.extui %214 : vector<16x32xi1> to vector<16x32xi32>
    %216 = arith.sitofp %215 : vector<16x32xi32> to vector<16x32xf32>
    %217 = arith.addf %199, %216 : vector<16x32xf32>
    %cst_69 = arith.constant 2.500000e-01 : f32
    %218 = vector.broadcast %cst_69 : f32 to vector<16x32xf32>
    %219 = arith.mulf %217, %218 : vector<16x32xf32>
    %cst_70 = arith.constant dense<0.000000e+00> : vector<32xf32>
    %220 = vector.multi_reduction <add>, %219, %cst_70 [0] : vector<16x32xf32> to vector<32xf32>
    %221 = vector.shape_cast %220 : vector<32xf32> to vector<1x32xf32>
    %cst_71 = arith.constant 6.250000e-02 : f32
    %222 = vector.broadcast %cst_71 : f32 to vector<1x32xf32>
    %223 = arith.mulf %221, %222 : vector<1x32xf32>
    %224 = vector.broadcast %223 : vector<1x32xf32> to vector<16x32xf32>
    %225 = arith.subf %219, %224 : vector<16x32xf32>
    %226 = arith.mulf %225, %225 : vector<16x32xf32>
    %cst_72 = arith.constant dense<0.000000e+00> : vector<32xf32>
    %227 = vector.multi_reduction <add>, %226, %cst_72 [0] : vector<16x32xf32> to vector<32xf32>
    %228 = vector.shape_cast %227 : vector<32xf32> to vector<1x32xf32>
    %cst_73 = arith.constant 6.250000e-02 : f32
    %229 = vector.broadcast %cst_73 : f32 to vector<1x32xf32>
    %230 = arith.mulf %228, %229 : vector<1x32xf32>
    %cst_74 = arith.constant 9.99999974E-6 : f32
    %231 = vector.broadcast %cst_74 : f32 to vector<1x32xf32>
    %232 = arith.addf %230, %231 : vector<1x32xf32>
    %233 = math.rsqrt %232 : vector<1x32xf32>
    %234 = vector.broadcast %233 : vector<1x32xf32> to vector<16x32xf32>
    %235 = arith.mulf %225, %234 : vector<16x32xf32>
    %c0_75 = arith.constant 0 : index
    %c0_76 = arith.constant 0 : index
    %236 = vector.load %arg11[%c0_75, %c0_76] : memref<16x32xf32, #tpu.memory_space<vmem>>, vector<16x32xf32>
    tpu.vector_store %arg11[%c0_75, %c0_76], %235 {strides = array<i32>} : memref<16x32xf32, #tpu.memory_space<vmem>>, vector<16x32xf32>,
    %c0_77 = arith.constant 0 : index
    %c0_78 = arith.constant 0 : index
    %c0_79 = arith.constant 0 : index
    %237 = vector.load %arg10[%c0_77, %c0_78, %c0_79] : memref<1x16x32xf32, #tpu.memory_space<vmem>>, vector<1x16x32xf32>
    %238 = vector.shape_cast %237 : vector<1x16x32xf32> to vector<16x32xf32>
    %239 = vector.shape_cast %235 : vector<16x32xf32> to vector<1x16x32xf32>
    tpu.vector_store %arg10[%c0_77, %c0_78, %c0_79], %239 {strides = array<i32>} : memref<1x16x32xf32, #tpu.memory_space<vmem>>, vector<1x16x32xf32>,
    return
  }
  func.func @transform_0(%arg0: i32) -> (i32, i32) {
    %c0_i32 = arith.constant 0 : i32
    %c0_i32_0 = arith.constant 0 : i32
    %c0_i32_1 = arith.constant 0 : i32
    return %c0_i32, %c0_i32_0 : i32, i32
  }
  func.func @transform_1(%arg0: i32) -> (i32, i32, i32) {
    %c0_i32 = arith.constant 0 : i32
    %c0_i32_0 = arith.constant 0 : i32
    %c0_i32_1 = arith.constant 0 : i32
    %c0_i32_2 = arith.constant 0 : i32
    return %c0_i32, %c0_i32_0, %c0_i32_1 : i32, i32, i32
  }
  func.func @transform_2(%arg0: i32) -> (i32, i32, i32) {
    %c0_i32 = arith.constant 0 : i32
    %c0_i32_0 = arith.constant 0 : i32
    %c0_i32_1 = arith.constant 0 : i32
    %c0_i32_2 = arith.constant 0 : i32
    return %c0_i32, %c0_i32_0, %c0_i32_1 : i32, i32, i32
  }
  func.func @transform_3(%arg0: i32) -> (i32, i32, i32) {
    %c0_i32 = arith.constant 0 : i32
    %c0_i32_0 = arith.constant 0 : i32
    %c0_i32_1 = arith.constant 0 : i32
    return %arg0, %c0_i32, %c0_i32_0 : i32, i32, i32
  }
  func.func @transform_4(%arg0: i32) -> (i32, i32, i32) {
    %c0_i32 = arith.constant 0 : i32
    %c0_i32_0 = arith.constant 0 : i32
    %c0_i32_1 = arith.constant 0 : i32
    return %arg0, %c0_i32, %c0_i32_0 : i32, i32, i32
  }
  func.func @transform_5(%arg0: i32) -> (i32, i32, i32) {
    %c0_i32 = arith.constant 0 : i32
    %c0_i32_0 = arith.constant 0 : i32
    %c0_i32_1 = arith.constant 0 : i32
    return %arg0, %c0_i32, %c0_i32_0 : i32, i32, i32
  }
  func.func @transform_6(%arg0: i32) -> (i32, i32, i32) {
    %c0_i32 = arith.constant 0 : i32
    %c0_i32_0 = arith.constant 0 : i32
    %c0_i32_1 = arith.constant 0 : i32
    return %arg0, %c0_i32, %c0_i32_0 : i32, i32, i32
  }
  func.func @transform_7(%arg0: i32) -> (i32, i32, i32) {
    %c0_i32 = arith.constant 0 : i32
    %c0_i32_0 = arith.constant 0 : i32
    %c0_i32_1 = arith.constant 0 : i32
    return %arg0, %c0_i32, %c0_i32_0 : i32, i32, i32
  }
  func.func @transform_8(%arg0: i32) -> (i32, i32, i32) {
    %c0_i32 = arith.constant 0 : i32
    %c0_i32_0 = arith.constant 0 : i32
    %c0_i32_1 = arith.constant 0 : i32
    return %arg0, %c0_i32, %c0_i32_0 : i32, i32, i32
  }
  func.func @transform_9(%arg0: i32) -> (i32, i32, i32) {
    %c0_i32 = arith.constant 0 : i32
    %c0_i32_0 = arith.constant 0 : i32
    %c0_i32_1 = arith.constant 0 : i32
    return %arg0, %c0_i32, %c0_i32_0 : i32, i32, i32
  }
}

</mosaic_0001>

<bundles_post_ra>
// kernel: tpu_custom_call.1
= control target key start
LH: loop header
LB: loop body
LE: loop exit
PB: predicated region body
PF: predicated region fallthrough
CT: control target
= control target key end

     0   :  { %s1865_s0 = inlined_call_operand.vmem [shape: f32[16,32], index: 0, kind: input, shape index: {}]   ;;  %s1866_s1 = inlined_call_operand.vmem [shape: bf16[2,16,8], index: 1, kind: input, shape index: {}]   ;;  %s1867_s2 = inlined_call_operand.vmem [shape: bf16[2,8,16], index: 2, kind: input, shape index: {}]   ;;  %s1868_s3 = inlined_call_operand.vmem [shape: f32[2,8,32], index: 3, kind: input, shape index: {}]   ;;  %s1869_s4 = inlined_call_operand.vmem [shape: f32[2,8,32], index: 4, kind: input, shape index: {}]   ;;  %s1870_s5 = inlined_call_operand.vmem [shape: bf16[2,32,128], index: 5, kind: input, shape index: {}]   ;;  %s1871_s6 = inlined_call_operand.vmem [shape: f32[2,1,128], index: 6, kind: input, shape index: {}]   ;;  %s1872_s7 = inlined_call_operand.vmem [shape: bf16[2,128,32], index: 7, kind: input, shape index: {}]   ;;  %s1873_s8 = inlined_call_operand.vmem [shape: f32[2,1,32], index: 8, kind: input, shape index: {}]   ;;  %s1874_s9 = inlined_call_operand.hbm [shape: f32[2,16,32], index: 9, kind: output, shape index: {}]  }
   0x1   :  { %1883 = sst [smem:[#allocation12_spill]] %s1868_s3 }
   0x2   :  { %1884 = sst [smem:[#allocation13_spill]] %s1874_s9 }
   0x3   :  { %14 = vsyncpa [#allocation4], 0 }
   0x4   :  { %16 = vsyncpa [#allocation4 + $0x1], 0  ;;  %s1597_s30 = smov 0   ;;  %s1599_s10 = smov 0  }
   0x5   :  { %s1601_s11 = smov 0   ;;  %s1603_s12 = smov 0  }
   0x6 LB: > { %1885 = sst [smem:[#allocation6_spill]] %s1527_s30  ;;  %s1618_s13 = sadd.s32 4294967295, %s1539_s12   ;;  %s1539_s12 = sphi %s1603_s12, %s1899_s12   ;;  %s1535_s11 = sphi %s1601_s11, %s1901_s11   ;;  %s1531_s10 = sphi %s1599_s10, %s1903_s10   ;;  %s1527_s30 = sphi %s1597_s30, %s1902_s30  }
   0x7   : > { %1886 = sst [smem:[#allocation7_spill]] %s1535_s11  ;;  %s1271_s14 = sadd.s32 4294967294, %s1539_s12  }
   0x8   : > { %1887 = sst [smem:[#allocation8_spill]] %s1539_s12  ;;  %s1622_s15 = sadd.s32 1, %s1539_s12  }
   0x9   : > { %1888 = sst [smem:[#allocation9_spill]] %s1622_s15  ;;  %s248_s16 = sadd.s32 1, %s1535_s11 }
   0xa   : > { %s245_s17 = ssub.s32 %s1539_s12, %s1622_s15  ;;  %p258_p0 = scmp.ne.s32.totalorder %s1535_s11, %s1531_s10 }
   0xb   : > { %p246_p1 = scmp.eq.s32.totalorder %s245_s17, 0  ;;  %p259_p2 = scmp.eq.s32.totalorder %s1618_s13, 1 }
   0xc   : > { %p264_p3 = scmp.ne.s32.totalorder %s1531_s10, %s1527_s30  ;;  %p265_p4 = scmp.eq.s32.totalorder %s1271_s14, 1 }
   0xd   : > { %s1633_s18 = scalar_select %p246_p1, %s1535_s11, %s248_s16  }
   0xe   : > { %p1635_p5 = por %p259_p2, %p258_p0  ;;  %p1639_p6 = por %p265_p4, %p264_p3 }
   0xf   : > { %1889 = sst [smem:[#allocation10_spill]] %s1633_s18  ;;  %p1274_p7 = scmp.ge.s32.totalorder %s1539_s12, 1 }
  0x10   : > { %s1891_s20 = scalar_select %p1639_p6, 1, 0 }
  0x11   : > { %p334_p8 = scmp.lt.s32.totalorder %s1539_s12, 3 }
  0x12   : > { %1892 = sst [smem:[#allocation11_spill]] %s1891_s20 }
  0x13   : > { %p335_p9 = pnand %p1274_p7, %p334_p8 }
  0x14   : > { %s1875_s21 = sand.u32 (!%p335_p9), 1, %s1531_s10   ;;  %p389_p10 = scmp.lt.s32.totalorder (!%p335_p9), %s1618_s13, 1 }
  0x15   : > { %338 = sbr.rel (%p335_p9) target bundleno = 1252 (0x4e4), region = 56  ;;  %s1275_s22 = sshll.u32 (!%p335_p9), %s1875_s21, 4 }
  0x16   : > { %s1893_s3 = sld [smem:[#allocation12_spill]] (!%p335_p9)  ;;  %p1282_p11 = scmp.ne.s32.totalorder (!%p335_p9), %s1618_s13, 0 }
  0x1c   : > { %s1650_s23 = scalar_select %p389_p10, %s1618_s13, 1 }
  0x1d   : > { %417 = sbr.rel (%p1282_p11) target bundleno = 36 (0x24), region = 60  ;;  %v418_v0 = vld [vmem:[%s1865_s0] sm:$0xff] (!%p1282_p11)  ;;  %vm420_vm0 = vcmask (!%p1282_p11), 261120   ;;  %v419_v1 = vld [vmem:[%s1865_s0 + $0x8] sm:$0xff] (!%p1282_p11) }
  0x1e   : > { %s1276_s24 = sshll.u32 %s1650_s23, 3  ;;  %s1331_s25 = sshll.u32 %s1650_s23, 4  ;;  %421 = vst.msk [vmem:[#allocation2] sm:$0xff] (!%p1282_p11), %vm420_vm0, %v418_v0  ;;  %422 = vst.msk [vmem:[#allocation2 + $0x8] sm:$0xff] (!%p1282_p11), %vm420_vm0, %v419_v1 }
  0x1f   : > { %s1657_s28 = scalar_lea.vmem %s1893_s3, %s1276_s24  ;;  %s1662_s16 = scalar_lea.vmem %s1869_s4, %s1276_s24 }
  0x20   : > { %s1667_s18 = scalar_lea.vmem %s1870_s5, %s1331_s25  ;;  %s404_s20 = scalar_lea.vmem %s1871_s6, %s1650_s23 }
  0x21   : > { %s1332_s30 = sshll.u32 %s1650_s23, 6  ;;  %s412_s26 = scalar_lea.vmem %s1873_s8, %s1650_s23 }
  0x22   : > { %s1681_s29 = scalar_lea.vmem %s1872_s7, %s1332_s30  ;;  %s1683_s24 = scalar_lea.vmem [#allocation3], %s1275_s22 }
  0x24 PF: > { %vm440_vm1 = vcmask 1043456   ;;  %v1541_v4 = vmov 0.0   ;;  %vm1542_vm2 = vmmov 0   ;;  %v1457_v7 = vld [vmem:[%s1866_s1] sm:$0xff]   ;;  %vm436_vm3 = vcmask 64512   ;;  %v1458_v10 = vld [vmem:[%s1866_s1 + $0x8] sm:$0xff]  }
  0x25   : > { %v1692_v2 = vld [vmem:[#allocation2] sm:$0xff]  ;;  %v1694_v3 = vld [vmem:[#allocation2 + $0x8] sm:$0xff]  ;;  %1357 = vmatprep.subr.bf16.mxu0 %v1541_v4  ;;  %1359 = vmatprep.mubr.msk.bf16.mxu0 %vm1542_vm2, %v1541_v4  ;;  %vm555_vm4 = vcmask 130048   ;;  %vm644_vm5 = vcmask 261120   ;;  %s1333_s23 = sshll.u32 %s1618_s13, 8  ;;  %s1894_s25 = sld [smem:[#allocation13_spill]] }
  0x26   : > { %v429_v5 = vpack.c.bf16 %v1692_v2, %v1692_v2  ;;  %v430_v6 = vpack.c.bf16 %v1694_v3, %v1694_v3  ;;  %v537_v12 = vld [vmem:[%s1657_s28] sm:$0xff]  ;;  %v1460_v38 = vld [vmem:[%s1667_s18 + $0x8] sm:$0xff]   ;;  %s1895_s13 = sand.u32 1, %s1531_s10   ;;  %s1544_s9 = smov [#allocation3]  }
  0x27   : > { %v538_v13 = vld [vmem:[%s1662_s16] sm:$0xff]  ;;  %s1824_s15 = scalar_lea.sflag [#allocation4], %s1895_s13  ;;  %s1481_s30 = sshll.u32 %s1544_s9, 4  ;;  %s1482_s30 = int_to_ptr.vmem [resolvable:$false] %s1481_s30 }
  0x28   : > { %v442_v8 = vsel %vm440_vm1, %v429_v5, 0  ;;  %v494_v9 = vsel %vm440_vm1, %v430_v6, 0  ;;  %v551_v26 = vld [vmem:[%s1867_s2] sm:$0xf]  ;;  %v552_v36 = vld [vmem:[%s1867_s2 + $0x4] sm:$0xf] }
  0x29   : > { %1358 = vmatpush3.bf16.msra.mxu0 %v442_v8  ;;  %v1459_v37 = vld [vmem:[%s1667_s18] sm:$0xff]   ;;  %s1483_s12 = scalar_lea.vmem %s1482_s30, 512 }
  0x2a   : > { %1363 = vmatprep.subr.bf16.mxu0 %v1541_v4 }
  0x2b   : > { %s1812_s11 = scalar_lea.hbm %s1894_s25, %s1333_s23 }
  0x2c   : > { %1360 = vmatmul.mubr.msk.bf16.vlgmr.msra.gmra.mrb[0].mxu0 %vm436_vm3, %v1457_v7 }
  0x2d   : > { %1364 = vmatpush3.bf16.msra.mxu0 %v494_v9  ;;  %1365 = vmatprep.mubr.msk.bf16.mxu0 %vm1542_vm2, %v1541_v4 }
  0x2e   : > { %1369 = vmatprep.subr.bf16.mxu0 %v1541_v4 }
  0x34   : > { %1366 = vmatmul.mubr.msk.bf16.vlgmr.msra.gmra.mrb[4].mxu0 %vm436_vm3, %v1458_v10 }
  0x35   : > { %1371 = vmatprep.mubr.msk.bf16.mxu0 %vm1542_vm2, %v1541_v4 }
  0xff   : > { %v478_v11 = vpop.f32.mrb[0].mxu0 }
 0x100   : > { %v1361_v14 = vpop.f32.mrb[1].mxu0  ;;  %v539_v16 = vmul.f32 %v537_v12, %v478_v11  ;;  %v545_v17 = vmul.f32 %v538_v13, %v478_v11 }
 0x101   : > { %v481_v15 = vpop.f32.mrb[2].mxu0 }
 0x102   : > { %v541_v18 = vmul.f32 %v538_v13, %v481_v15  ;;  %v547_v19 = vmul.f32 %v537_v12, %v481_v15  ;;  %v1362_v20 = vpop.f32.mrb[3].mxu0  ;;  %v1461_v15 = vld [vmem:[%s1681_s29] sm:$0xff]  }
 0x103   : > { %1389 = vmatprep.subr.bf16.mxu1 %v1461_v15  ;;  %v1466_v20 = vld [vmem:[%s1681_s29 + $0x28] sm:$0xff]  }
 0x104   : > { %v543_v21 = vsub.f32 %v539_v16, %v541_v18  ;;  %v549_v22 = vadd.f32 %v547_v19, %v545_v17  ;;  %1390 = vmatpush3.bf16.msra.mxu1 %v1461_v15  ;;  %v1462_v16 = vld [vmem:[%s1681_s29 + $0x8] sm:$0xff]   ;;  %v1463_v17 = vld [vmem:[%s1681_s29 + $0x10] sm:$0xff]   ;;  %v1464_v18 = vld [vmem:[%s1681_s29 + $0x18] sm:$0xff]  }
 0x105   : > { %1391 = vmatprep.subr.bf16.mxu1 %v1462_v16  ;;  %v1465_v19 = vld [vmem:[%s1681_s29 + $0x20] sm:$0xff]  }
 0x106   : > { %v553_v23 = vpack.c.bf16 %v549_v22, %v543_v21  ;;  %v1467_v21 = vld [vmem:[%s1681_s29 + $0x30] sm:$0xff]   ;;  %v1468_v22 = vld [vmem:[%s1681_s29 + $0x38] sm:$0xff]  }
 0x107   : > { %v530_v24 = vpop.f32.mrb[4].mxu0 }
 0x108   : > { %v1367_v25 = vpop.f32.mrb[5].mxu0  ;;  %1370 = vmatpush3.bf16.msra.mxu0 %v553_v23  ;;  %v540_v28 = vmul.f32 %v537_v12, %v530_v24  ;;  %v546_v29 = vmul.f32 %v538_v13, %v530_v24  ;;  %1392 = vmatpush3.bf16.msra.mxu1 %v1462_v16  ;;  %v1289_v23 = vld [vmem:[%s404_s20] ss:$0 sm:$0xff] }
 0x109   : > { %v533_v27 = vpop.f32.mrb[6].mxu0  ;;  %1375 = vmatprep.subr.bf16.mxu0 %v1541_v4  ;;  %1393 = vmatprep.subr.bf16.mxu1 %v1463_v17 }
 0x10a   : > { %v542_v30 = vmul.f32 %v538_v13, %v533_v27  ;;  %v548_v31 = vmul.f32 %v537_v12, %v533_v27  ;;  %v1368_v32 = vpop.f32.mrb[7].mxu0 }
 0x10b   : > { %1372 = vmatmul.mubr.msk.bf16.vlgmr.msra.gmra.mrb[8].mxu0 %vm555_vm4, %v551_v26 }
 0x10c   : > { %v544_v33 = vsub.f32 %v540_v28, %v542_v30  ;;  %v550_v34 = vadd.f32 %v548_v31, %v546_v29  ;;  %1377 = vmatprep.mubr.msk.bf16.mxu0 %vm1542_vm2, %v1541_v4  ;;  %1394 = vmatpush3.bf16.msra.mxu1 %v1463_v17 }
 0x10d   : > { %1395 = vmatprep.subr.bf16.mxu1 %v1464_v18 }
 0x10e   : > { %v554_v35 = vpack.c.bf16 %v550_v34, %v544_v33 }
 0x110   : > { %1376 = vmatpush3.bf16.msra.mxu0 %v554_v35  ;;  %1396 = vmatpush3.bf16.msra.mxu1 %v1464_v18 }
 0x111   : > { %1381 = vmatprep.subr.bf16.mxu0 %v1541_v4  ;;  %1397 = vmatprep.subr.bf16.mxu1 %v1465_v19 }
 0x113   : > { %1378 = vmatmul.mubr.msk.bf16.vlgmr.msra.gmra.mrb[12].mxu0 %vm555_vm4, %v552_v36 }
 0x114   : > { %1385 = vmatprep.mubr.msk.bf16.mxu0 %vm1542_vm2, %v1541_v4  ;;  %1382 = vmatpush3.bf16.msra.mxu0 %v1459_v37 }
 0x115   : > { %1383 = vmatprep.subr.bf16.mxu0 %v1541_v4  ;;  %1398 = vmatpush3.bf16.msra.mxu1 %v1465_v19 }
 0x116   : > { %1399 = vmatprep.subr.bf16.mxu1 %v1466_v20 }
 0x118   : > { %1384 = vmatpush3.bf16.msra.mxu0 %v1460_v38 }
 0x119   : > { %1400 = vmatpush3.bf16.msra.mxu1 %v1466_v20 }
 0x11a   : > { %1401 = vmatprep.subr.bf16.mxu1 %v1467_v21 }
 0x11d   : > { %1402 = vmatpush3.bf16.msra.mxu1 %v1467_v21 }
 0x11e   : > { %1403 = vmatprep.subr.bf16.mxu1 %v1468_v22 }
 0x121   : > { %1404 = vmatpush3.bf16.msra.mxu1 %v1468_v22 }
 0x1de   : > { %v593_v39 = vpop.f32.mrb[8].mxu0 }
 0x1df   : > { %v1373_v40 = vpop.f32.mrb[9].mxu0  ;;  %v642_v43 = vadd.f32 %v593_v39, %v1692_v2 }
 0x1e0   : > { %v596_v41 = vpop.f32.mrb[10].mxu0 }
 0x1e1   : > { %v1374_v42 = vpop.f32.mrb[11].mxu0  ;;  %v645_v48 = vsel %vm644_vm5, %v642_v43, 0.0 }
 0x1e6   : > { %v636_v44 = vpop.f32.mrb[12].mxu0 }
 0x1e7   : > { %v643_v45 = vadd.f32 %v636_v44, %v1694_v3  ;;  %v1379_v46 = vpop.f32.mrb[13].mxu0 }
 0x1e8   : > { %v639_v47 = vpop.f32.mrb[14].mxu0 }
 0x1e9   : > { %v646_v49 = vsel %vm644_vm5, %v643_v45, 0.0  ;;  %v1380_v50 = vpop.f32.mrb[15].mxu0 }
 0x1ea   : > { %v647_v51 = vadd.f32 %v646_v49, %v645_v48 }
 0x1ec   : > { %v648_v52 = vrot.slane %v647_v51, 4 }
 0x1ee   : > { %v649_v53 = vadd.f32 %v648_v52, %v647_v51 }
 0x1f0   : > { %v650_v54 = vrot.slane %v649_v53, 2 }
 0x1f2   : > { %v651_v55 = vadd.f32 %v650_v54, %v649_v53 }
 0x1f4   : > { %v652_v56 = vrot.slane %v651_v55, 1 }
 0x1f6   : > { %v653_v57 = vadd.f32 %v652_v56, %v651_v55 }
 0x1f8   : > { %v654_v58 = vmul.f32 0.0625, %v653_v57 }
 0x1fa   : > { %v655_v59 = vsub.f32 %v642_v43, %v654_v58  ;;  %v656_v60 = vsub.f32 %v643_v45, %v654_v58 }
 0x1fc   : > { %v657_v61 = vmul.f32 %v655_v59, %v655_v59  ;;  %v658_v62 = vmul.f32 %v656_v60, %v656_v60 }
 0x1fe   : > { %v659_v63 = vsel %vm644_vm5, %v657_v61, 0.0  ;;  %v660_v0 = vsel %vm644_vm5, %v658_v62, 0.0 }
 0x1ff   : > { %v661_v1 = vadd.f32 %v660_v0, %v659_v63 }
 0x201   : > { %v662_v2 = vrot.slane %v661_v1, 4 }
 0x203   : > { %v663_v3 = vadd.f32 %v662_v2, %v661_v1 }
 0x205   : > { %v664_v5 = vrot.slane %v663_v3, 2 }
 0x207   : > { %v665_v6 = vadd.f32 %v664_v5, %v663_v3 }
 0x209   : > { %v666_v7 = vrot.slane %v665_v6, 1 }
 0x20b   : > { %v667_v8 = vadd.f32 %v666_v7, %v665_v6 }
 0x20d   : > { %v668_v9 = vmul.f32 0.0625, %v667_v8 }
 0x20f   : > { %v669_v10 = vadd.f32 1e-05, %v668_v9 }
 0x211   : > { %1469 = vrsqrt.f32 %v669_v10 }
 0x21b   : > { %v1470_v11 = vpop.eup %1469 }
 0x21c   : > { %v1740_v12 = vmul.f32 %v1470_v11, %v655_v59  ;;  %v1742_v13 = vmul.f32 %v1470_v11, %v656_v60  ;;  %v1543_v60 = vmov 1.0|1.0  }
 0x21e   : > { %v673_v14 = vpack.c.bf16 %v1742_v13, %v1740_v12 }
 0x220   : > { %1386 = vmatmul.mubr.msk.bf16.vlgmr.msra.gmra.mrb[16].mxu0 %vm644_vm5, %v673_v14 }
 0x2f3   : > { %v734_v24 = vpop.f32.mrb[16].mxu0 }
 0x2f4   : > { %v1387_v25 = vpop.f32.mrb[17].mxu0  ;;  %v735_v27 = vadd.f32 %v1289_v23, %v734_v24 }
 0x2f5   : > { %v737_v26 = vpop.f32.mrb[18].mxu0 }
 0x2f6   : > { %v738_v28 = vadd.f32 %v1289_v23, %v737_v26  ;;  %v1388_v29 = vpop.f32.mrb[19].mxu0 }
 0x2f8   : > { %v741_v30 = vadd.f32 %v738_v28, %v735_v27 }
 0x2fa   : > { %v742_v31 = vrot.slane %v741_v30, 4 }
 0x2fc   : > { %v743_v32 = vadd.f32 %v742_v31, %v741_v30 }
 0x2fe   : > { %v744_v33 = vrot.slane %v743_v32, 2 }
 0x300   : > { %v745_v34 = vadd.f32 %v744_v33, %v743_v32  ;;  %v1301_v32 = vld [vmem:[%s412_s26] ss:$0 sm:$0xff]  ;;  %s1155_s26 = sshll.u32 %s1683_s24, 4  ;;  %s1814_s26 = int_to_ptr.vmem [resolvable:$true] %s1155_s26 }
 0x301   : > { %s1477_s3 = scalar_lea.vmem %s1814_s26, 256  ;;  %p1484_p1 = scmp.lt.s32.totalorder %s1814_s26, %s1482_s30 }
 0x302   : > { %v746_v35 = vrot.slane %v745_v34, 1  ;;  %p1478_p12 = scmp.ne.s32.totalorder %s1814_s26, %s1477_s3  ;;  %p1485_p2 = scmp.lt.s32.totalorder %s1483_s12, %s1477_s3 }
 0x304   : > { %v747_v36 = vadd.f32 %v746_v35, %v745_v34  ;;  %p1479_p13 = pnand %p1478_p12, %p1635_p5  ;;  %p1486_p3 = por %p1485_p2, %p1484_p1 }
 0x306   : > { %v748_v37 = vmul.f32 0.0625, %v747_v36  ;;  %p1480_p0 = pneg %p1479_p13 }
 0x308   : > { %v749_v38 = vsub.f32 %v735_v27, %v748_v37  ;;  %v750_v39 = vsub.f32 %v738_v28, %v748_v37  ;;  %p1487_p4 = pnand %p1486_p3, %p1480_p0 }
 0x30a   : > { %v751_v40 = vmul.f32 %v749_v38, %v749_v38  ;;  %v752_v41 = vmul.f32 %v750_v39, %v750_v39 }
 0x30c   : > { %v753_v42 = vadd.f32 %v752_v41, %v751_v40 }
 0x30e   : > { %v754_v43 = vrot.slane %v753_v42, 4 }
 0x310   : > { %v755_v44 = vadd.f32 %v754_v43, %v753_v42 }
 0x312   : > { %v756_v45 = vrot.slane %v755_v44, 2 }
 0x314   : > { %v757_v46 = vadd.f32 %v756_v45, %v755_v44 }
 0x316   : > { %v758_v47 = vrot.slane %v757_v46, 1 }
 0x318   : > { %v759_v48 = vadd.f32 %v758_v47, %v757_v46 }
 0x31a   : > { %v760_v49 = vmul.f32 0.0625, %v759_v48 }
 0x31c   : > { %v761_v50 = vadd.f32 1e-05, %v760_v49 }
 0x31e   : > { %1471 = vrsqrt.f32 %v761_v50 }
 0x328   : > { %v1472_v51 = vpop.eup %1471 }
 0x329   : > { %v763_v52 = vmul.f32 %v1472_v51, %v749_v38  ;;  %v764_v53 = vmul.f32 %v1472_v51, %v750_v39 }
 0x32b   : > { %v765_v54 = vmul.f32 0.5, %v763_v52  ;;  %v766_v55 = vmul.f32 0.5, %v764_v53 }
 0x32d   : > { %vm769_vm6 = vcmp.ge.f32.partialorder %v765_v54, 1.0  ;;  %vm770_vm7 = vcmp.ge.f32.partialorder %v766_v55, 1.0 }
 0x32e   : > { %v1293_v56 = vsel %vm769_vm6, 1.0, %v1541_v4  ;;  %v1294_v57 = vsel %vm770_vm7, 1.0, %v1541_v4  ;;  %vm1310_vm8 = vmpackc.low %vm770_vm7, %vm769_vm6 }
 0x32f   : > { %v776_v58 = vsub.f32 1.0, %v1293_v56  ;;  %v777_v59 = vsub.f32 1.0, %v1294_v57  ;;  %1405 = vmatprep.mubr.msk.bf16.mxu1 %vm1310_vm8, %v1543_v60 }
 0x331   : > { %v778_v61 = vmul.f32 %v776_v58, %v765_v54  ;;  %v779_v62 = vmul.f32 %v777_v59, %v766_v55 }
 0x333   : > { %v780_v63 = vsub.f32 %v763_v52, %v778_v61  ;;  %v781_v0 = vsub.f32 %v764_v53, %v779_v62 }
 0x335   : > { %v782_v1 = vmul.f32 0.5, %v780_v63  ;;  %v783_v2 = vmul.f32 0.5, %v781_v0 }
 0x337   : > { %v784_v3 = vadd.f32 %v782_v1, %v778_v61  ;;  %v785_v5 = vadd.f32 %v783_v2, %v779_v62 }
 0x339   : > { %vm786_vm9 = vcmp.ge.f32.partialorder %v784_v3, 1.0  ;;  %vm787_vm10 = vcmp.ge.f32.partialorder %v785_v5, 1.0 }
 0x33a   : > { %v1295_v6 = vsel %vm786_vm9, 1.0, %v1541_v4  ;;  %v1296_v7 = vsel %vm787_vm10, 1.0, %v1541_v4  ;;  %vm1312_vm11 = vmpackc.low %vm787_vm10, %vm786_vm9 }
 0x33b   : > { %v793_v8 = vsub.f32 1.0, %v1295_v6  ;;  %v794_v9 = vsub.f32 1.0, %v1296_v7  ;;  %1406 = vmatmul.mubr.msk.bf16.vlgmr.msra.gmra.mrb[0].mxu1 %vm1312_vm11, %v1543_v60 }
 0x33d   : > { %v795_v10 = vmul.f32 %v793_v8, %v784_v3  ;;  %v796_v11 = vmul.f32 %v794_v9, %v785_v5 }
 0x33f   : > { %v797_v14 = vsub.f32 %v763_v52, %v795_v10  ;;  %v798_v15 = vsub.f32 %v764_v53, %v796_v11 }
 0x341   : > { %v799_v16 = vmul.f32 0.5, %v797_v14  ;;  %v800_v17 = vmul.f32 0.5, %v798_v15 }
 0x343   : > { %v801_v18 = vadd.f32 %v799_v16, %v795_v10  ;;  %v802_v19 = vadd.f32 %v800_v17, %v796_v11 }
 0x345   : > { %vm803_vm12 = vcmp.ge.f32.partialorder %v801_v18, 1.0  ;;  %vm804_vm13 = vcmp.ge.f32.partialorder %v802_v19, 1.0 }
 0x346   : > { %v1297_v20 = vsel %vm803_vm12, 1.0, %v1541_v4  ;;  %v1298_v21 = vsel %vm804_vm13, 1.0, %v1541_v4  ;;  %vm1314_vm14 = vmpackc.low %vm804_vm13, %vm803_vm12 }
 0x347   : > { %v810_v22 = vsub.f32 1.0, %v1297_v20  ;;  %v811_v23 = vsub.f32 1.0, %v1298_v21  ;;  %1409 = vmatprep.mubr.msk.bf16.mxu1 %vm1314_vm14, %v1543_v60 }
 0x349   : > { %v812_v24 = vmul.f32 %v810_v22, %v801_v18  ;;  %v813_v25 = vmul.f32 %v811_v23, %v802_v19 }
 0x34b   : > { %v814_v26 = vsub.f32 %v763_v52, %v812_v24  ;;  %v815_v27 = vsub.f32 %v764_v53, %v813_v25 }
 0x34d   : > { %v816_v28 = vmul.f32 0.5, %v814_v26  ;;  %v817_v29 = vmul.f32 0.5, %v815_v27 }
 0x34f   : > { %v818_v30 = vadd.f32 %v816_v28, %v812_v24  ;;  %v819_v31 = vadd.f32 %v817_v29, %v813_v25 }
 0x351   : > { %vm820_vm15 = vcmp.ge.f32.partialorder %v818_v30, 1.0  ;;  %vm821_vm0 = vcmp.ge.f32.partialorder %v819_v31, 1.0 }
 0x352   : > { %vm1316_vm1 = vmpackc.low %vm821_vm0, %vm820_vm15 }
 0x353   : > { %1410 = vmatmul.mubr.msk.bf16.gmra.mrb[4].mxu1 %vm1316_vm1, %v1543_v60 }
 0x40e   : > { %v1407_v33 = vpop.f32.mrb[0].mxu1 }
 0x40f   : > { %v932_v34 = vpop.f32.mrb[1].mxu1  ;;  %v941_v35 = vadd.f32 %v1407_v33, %v1301_v32 }
 0x410   : > { %v933_v36 = vadd.f32 %v1301_v32, %v932_v34  ;;  %v1408_v37 = vpop.f32.mrb[2].mxu1 }
 0x411   : > { %v935_v38 = vpop.f32.mrb[3].mxu1  ;;  %v944_v40 = vadd.f32 %v1408_v37, %v1301_v32  ;;  %v965_v42 = vadd.f32 %v941_v35, %v1740_v12 }
 0x412   : > { %v963_v39 = vadd.f32 %v933_v36, %v1740_v12  ;;  %v936_v41 = vadd.f32 %v1301_v32, %v935_v38 }
 0x413   : > { %v966_v45 = vadd.f32 %v944_v40, %v1742_v13  ;;  %v974_v48 = vsel %vm644_vm5, %v965_v42, 0.0 }
 0x414   : > { %v964_v43 = vadd.f32 %v936_v41, %v1742_v13  ;;  %v971_v44 = vsel %vm644_vm5, %v963_v39, 0.0 }
 0x415   : > { %v976_v50 = vsel %vm644_vm5, %v966_v45, 0.0 }
 0x416   : > { %v972_v46 = vsel %vm644_vm5, %v964_v43, 0.0 }
 0x417   : > { %v973_v47 = vadd.f32 %v972_v46, %v971_v44 }
 0x419   : > { %v975_v49 = vadd.f32 %v974_v48, %v973_v47 }
 0x41b   : > { %v977_v51 = vadd.f32 %v976_v50, %v975_v49 }
 0x426   : > { %v1411_v52 = vpop.f32.mrb[4].mxu1 }
 0x427   : > { %v948_v53 = vpop.f32.mrb[5].mxu1  ;;  %v957_v54 = vadd.f32 %v1411_v52, %v1301_v32 }
 0x428   : > { %v949_v55 = vadd.f32 %v1301_v32, %v948_v53  ;;  %v1412_v56 = vpop.f32.mrb[6].mxu1 }
 0x429   : > { %v951_v57 = vpop.f32.mrb[7].mxu1  ;;  %v960_v59 = vadd.f32 %v1412_v56, %v1301_v32  ;;  %v969_v61 = vadd.f32 %v957_v54, %v1740_v12 }
 0x42a   : > { %v967_v58 = vadd.f32 %v949_v55, %v1740_v12  ;;  %v952_v60 = vadd.f32 %v1301_v32, %v951_v57 }
 0x42b   : > { %v970_v1 = vadd.f32 %v960_v59, %v1742_v13  ;;  %v982_v5 = vsel %vm644_vm5, %v969_v61, 0.0 }
 0x42c   : > { %v978_v62 = vsel %vm644_vm5, %v967_v58, 0.0  ;;  %v968_v63 = vadd.f32 %v952_v60, %v1742_v13 }
 0x42d   : > { %v979_v0 = vadd.f32 %v978_v62, %v977_v51  ;;  %v984_v7 = vsel %vm644_vm5, %v970_v1, 0.0 }
 0x42e   : > { %v980_v2 = vsel %vm644_vm5, %v968_v63, 0.0 }
 0x42f   : > { %v981_v3 = vadd.f32 %v980_v2, %v979_v0 }
 0x431   : > { %v983_v6 = vadd.f32 %v982_v5, %v981_v3 }
 0x433   : > { %v985_v8 = vadd.f32 %v984_v7, %v983_v6 }
 0x435   : > { %v986_v9 = vrot.slane %v985_v8, 4 }
 0x437   : > { %v987_v10 = vadd.f32 %v986_v9, %v985_v8 }
 0x439   : > { %v988_v11 = vrot.slane %v987_v10, 2 }
 0x43b   : > { %v989_v12 = vadd.f32 %v988_v11, %v987_v10 }
 0x43d   : > { %v990_v14 = vrot.slane %v989_v12, 1 }
 0x43f   : > { %v991_v15 = vadd.f32 %v990_v14, %v989_v12 }
 0x441   : > { %v992_v16 = vmul.f32 0.015625, %v991_v15 }
 0x443   : > { %v993_v17 = vsub.f32 %v963_v39, %v992_v16  ;;  %v994_v18 = vsub.f32 %v964_v43, %v992_v16  ;;  %v995_v19 = vsub.f32 %v965_v42, %v992_v16  ;;  %v996_v13 = vsub.f32 %v966_v45, %v992_v16 }
 0x444   : > { %v997_v20 = vsub.f32 %v967_v58, %v992_v16  ;;  %v998_v21 = vsub.f32 %v968_v63, %v992_v16  ;;  %v999_v22 = vsub.f32 %v969_v61, %v992_v16  ;;  %v1000_v23 = vsub.f32 %v970_v1, %v992_v16 }
 0x445   : > { %v1001_v24 = vmul.f32 %v993_v17, %v993_v17  ;;  %v1002_v25 = vmul.f32 %v994_v18, %v994_v18  ;;  %v1003_v26 = vmul.f32 %v995_v19, %v995_v19  ;;  %v1004_v27 = vmul.f32 %v996_v13, %v996_v13 }
 0x446   : > { %v1005_v31 = vmul.f32 %v997_v20, %v997_v20  ;;  %v1006_v34 = vmul.f32 %v998_v21, %v998_v21  ;;  %v1007_v37 = vmul.f32 %v999_v22, %v999_v22  ;;  %v1008_v40 = vmul.f32 %v1000_v23, %v1000_v23 }
 0x447   : > { %v1009_v28 = vsel %vm644_vm5, %v1001_v24, 0.0  ;;  %v1010_v29 = vsel %vm644_vm5, %v1002_v25, 0.0  ;;  %v1012_v32 = vsel %vm644_vm5, %v1003_v26, 0.0  ;;  %v1014_v35 = vsel %vm644_vm5, %v1004_v27, 0.0 }
 0x448   : > { %v1011_v30 = vadd.f32 %v1010_v29, %v1009_v28  ;;  %v1016_v38 = vsel %vm644_vm5, %v1005_v31, 0.0  ;;  %v1018_v41 = vsel %vm644_vm5, %v1006_v34, 0.0  ;;  %v1020_v43 = vsel %vm644_vm5, %v1007_v37, 0.0 }
 0x449   : > { %v1022_v45 = vsel %vm644_vm5, %v1008_v40, 0.0 }
 0x44a   : > { %v1013_v33 = vadd.f32 %v1012_v32, %v1011_v30 }
 0x44c   : > { %v1015_v36 = vadd.f32 %v1014_v35, %v1013_v33 }
 0x44e   : > { %v1017_v39 = vadd.f32 %v1016_v38, %v1015_v36 }
 0x450   : > { %v1019_v42 = vadd.f32 %v1018_v41, %v1017_v39 }
 0x452   : > { %v1021_v44 = vadd.f32 %v1020_v43, %v1019_v42 }
 0x454   : > { %v1023_v46 = vadd.f32 %v1022_v45, %v1021_v44 }
 0x456   : > { %v1024_v47 = vrot.slane %v1023_v46, 4 }
 0x458   : > { %v1025_v48 = vadd.f32 %v1024_v47, %v1023_v46 }
 0x45a   : > { %v1026_v49 = vrot.slane %v1025_v48, 2 }
 0x45c   : > { %v1027_v50 = vadd.f32 %v1026_v49, %v1025_v48 }
 0x45e   : > { %v1028_v51 = vrot.slane %v1027_v50, 1 }
 0x460   : > { %v1029_v52 = vadd.f32 %v1028_v51, %v1027_v50 }
 0x462   : > { %v1030_v53 = vmul.f32 0.015625, %v1029_v52 }
 0x464   : > { %v1031_v54 = vadd.f32 1e-05, %v1030_v53 }
 0x466   : > { %1473 = vrsqrt.f32 %v1031_v54 }
 0x470   : > { %v1474_v55 = vpop.eup %1473 }
 0x471   : > { %v1033_v56 = vmul.f32 %v1474_v55, %v993_v17  ;;  %v1034_v57 = vmul.f32 %v1474_v55, %v994_v18  ;;  %v1051_v58 = vmul.f32 %v1474_v55, %v995_v19  ;;  %v1052_v59 = vmul.f32 %v1474_v55, %v996_v13 }
 0x472   : > { %v1071_v60 = vmul.f32 %v1474_v55, %v997_v20  ;;  %v1072_v61 = vmul.f32 %v1474_v55, %v998_v21  ;;  %v1091_v62 = vmul.f32 %v1474_v55, %v999_v22  ;;  %v1092_v63 = vmul.f32 %v1474_v55, %v1000_v23 }
 0x473   : > { %v1035_v0 = vmul.f32 0.5, %v1033_v56  ;;  %v1036_v1 = vmul.f32 0.5, %v1034_v57 }
 0x475   : > { %vm1039_vm2 = vcmp.ge.f32.partialorder %v1035_v0, 1.0  ;;  %vm1040_vm3 = vcmp.ge.f32.partialorder %v1036_v1, 1.0 }
 0x476   : > { %v1318_v2 = vsel %vm1039_vm2, 1.0, %v1541_v4  ;;  %v1319_v3 = vsel %vm1040_vm3, 1.0, %v1541_v4 }
 0x477   : > { %v1047_v5 = vsub.f32 1.0, %v1318_v2  ;;  %v1048_v6 = vsub.f32 1.0, %v1319_v3 }
 0x479   : > { %v1049_v7 = vmul.f32 %v1047_v5, %v1035_v0  ;;  %v1050_v8 = vmul.f32 %v1048_v6, %v1036_v1 }
 0x47b   : > { %v1053_v9 = vsub.f32 %v1051_v58, %v1049_v7  ;;  %v1054_v10 = vsub.f32 %v1052_v59, %v1050_v8 }
 0x47d   : > { %v1055_v11 = vmul.f32 0.5, %v1053_v9  ;;  %v1056_v12 = vmul.f32 0.5, %v1054_v10 }
 0x47f   : > { %v1057_v14 = vadd.f32 %v1055_v11, %v1049_v7  ;;  %v1058_v15 = vadd.f32 %v1056_v12, %v1050_v8 }
 0x481   : > { %vm1059_vm4 = vcmp.ge.f32.partialorder %v1057_v14, 1.0  ;;  %vm1060_vm6 = vcmp.ge.f32.partialorder %v1058_v15, 1.0 }
 0x482   : > { %v1320_v16 = vsel %vm1059_vm4, 1.0, %v1541_v4  ;;  %v1321_v17 = vsel %vm1060_vm6, 1.0, %v1541_v4 }
 0x483   : > { %v1066_v18 = vadd.f32 %v1321_v17, %v1319_v3  ;;  %v1067_v19 = vsub.f32 1.0, %v1320_v16  ;;  %v1068_v13 = vsub.f32 1.0, %v1321_v17  ;;  %v1065_v20 = vadd.f32 %v1320_v16, %v1318_v2 }
 0x485   : > { %v1069_v21 = vmul.f32 %v1067_v19, %v1057_v14  ;;  %v1070_v22 = vmul.f32 %v1068_v13, %v1058_v15 }
 0x487   : > { %v1073_v23 = vsub.f32 %v1071_v60, %v1069_v21  ;;  %v1074_v24 = vsub.f32 %v1072_v61, %v1070_v22 }
 0x489   : > { %v1075_v25 = vmul.f32 0.5, %v1073_v23  ;;  %v1076_v26 = vmul.f32 0.5, %v1074_v24 }
 0x48b   : > { %v1077_v27 = vadd.f32 %v1075_v25, %v1069_v21  ;;  %v1078_v28 = vadd.f32 %v1076_v26, %v1070_v22 }
 0x48d   : > { %vm1079_vm7 = vcmp.ge.f32.partialorder %v1077_v27, 1.0  ;;  %vm1080_vm8 = vcmp.ge.f32.partialorder %v1078_v28, 1.0 }
 0x48e   : > { %v1322_v29 = vsel %vm1079_vm7, 1.0, %v1541_v4  ;;  %v1323_v30 = vsel %vm1080_vm8, 1.0, %v1541_v4 }
 0x48f   : > { %v1086_v31 = vadd.f32 %v1323_v30, %v1066_v18  ;;  %v1087_v32 = vsub.f32 1.0, %v1322_v29  ;;  %v1088_v33 = vsub.f32 1.0, %v1323_v30  ;;  %v1085_v34 = vadd.f32 %v1322_v29, %v1065_v20 }
 0x491   : > { %v1089_v35 = vmul.f32 %v1087_v32, %v1077_v27  ;;  %v1090_v36 = vmul.f32 %v1088_v33, %v1078_v28 }
 0x493   : > { %v1093_v37 = vsub.f32 %v1091_v62, %v1089_v35  ;;  %v1094_v38 = vsub.f32 %v1092_v63, %v1090_v36 }
 0x495   : > { %v1095_v39 = vmul.f32 0.5, %v1093_v37  ;;  %v1096_v40 = vmul.f32 0.5, %v1094_v38 }
 0x497   : > { %v1098_v41 = vadd.f32 %v1096_v40, %v1090_v36  ;;  %v1097_v42 = vadd.f32 %v1095_v39, %v1089_v35 }
 0x499   : > { %vm1100_vm9 = vcmp.ge.f32.partialorder %v1098_v41, 1.0  ;;  %vm1099_vm10 = vcmp.ge.f32.partialorder %v1097_v42, 1.0 }
 0x49a   : > { %v1325_v43 = vsel %vm1100_vm9, 1.0, %v1541_v4  ;;  %v1324_v44 = vsel %vm1099_vm10, 1.0, %v1541_v4 }
 0x49b   : > { %v1106_v45 = vadd.f32 %v1325_v43, %v1086_v31  ;;  %v1105_v46 = vadd.f32 %v1324_v44, %v1085_v34 }
 0x49d   : > { %v1108_v47 = vmul.f32 0.25, %v1106_v45  ;;  %v1107_v48 = vmul.f32 0.25, %v1105_v46 }
 0x49f   : > { %v1110_v49 = vsel %vm644_vm5, %v1108_v47, 0.0  ;;  %v1109_v50 = vsel %vm644_vm5, %v1107_v48, 0.0 }
 0x4a0   : > { %v1111_v51 = vadd.f32 %v1110_v49, %v1109_v50 }
 0x4a2   : > { %v1112_v52 = vrot.slane %v1111_v51, 4 }
 0x4a4   : > { %v1113_v53 = vadd.f32 %v1112_v52, %v1111_v51 }
 0x4a6   : > { %v1114_v54 = vrot.slane %v1113_v53, 2 }
 0x4a8   : > { %v1115_v55 = vadd.f32 %v1114_v54, %v1113_v53 }
 0x4aa   : > { %v1116_v56 = vrot.slane %v1115_v55, 1 }
 0x4ac   : > { %v1117_v57 = vadd.f32 %v1116_v56, %v1115_v55 }
 0x4ae   : > { %v1118_v58 = vmul.f32 0.0625, %v1117_v57 }
 0x4b0   : > { %v1119_v59 = vsub.f32 %v1107_v48, %v1118_v58  ;;  %v1120_v60 = vsub.f32 %v1108_v47, %v1118_v58 }
 0x4b2   : > { %v1121_v4 = vmul.f32 %v1119_v59, %v1119_v59  ;;  %v1122_v61 = vmul.f32 %v1120_v60, %v1120_v60 }
 0x4b4   : > { %v1123_v62 = vsel %vm644_vm5, %v1121_v4, 0.0  ;;  %v1124_v63 = vsel %vm644_vm5, %v1122_v61, 0.0 }
 0x4b5   : > { %v1125_v0 = vadd.f32 %v1124_v63, %v1123_v62 }
 0x4b7   : > { %v1126_v1 = vrot.slane %v1125_v0, 4 }
 0x4b9   : > { %v1127_v2 = vadd.f32 %v1126_v1, %v1125_v0 }
 0x4bb   : > { %v1128_v3 = vrot.slane %v1127_v2, 2 }
 0x4bd   : > { %v1129_v5 = vadd.f32 %v1128_v3, %v1127_v2 }
 0x4bf   : > { %v1130_v6 = vrot.slane %v1129_v5, 1 }
 0x4c1   : > { %v1131_v7 = vadd.f32 %v1130_v6, %v1129_v5 }
 0x4c3   : > { %v1132_v8 = vmul.f32 0.0625, %v1131_v7 }
 0x4c5   : > { %v1133_v9 = vadd.f32 1e-05, %v1132_v8 }
 0x4c7   : > { %1475 = vrsqrt.f32 %v1133_v9 }
 0x4d1   : > { %v1476_v10 = vpop.eup %1475 }
 0x4d2   : > { %v1135_v11 = vmul.f32 %v1476_v10, %v1119_v59  ;;  %v1136_v12 = vmul.f32 %v1476_v10, %v1120_v60 }
 0x4d4   : > { %1137 = vst.msk [vmem:[#allocation2] sm:$0xff] %vm644_vm5, %v1135_v11  ;;  %1138 = vst.msk [vmem:[#allocation2 + $0x8] sm:$0xff] %vm644_vm5, %v1136_v12 }
 0x4d5   : > { %1139 = vst.msk [vmem:[%s1683_s24] sm:$0xff] %vm644_vm5, %v1135_v11  ;;  %1140 = vst.msk [vmem:[%s1683_s24 + $0x8] sm:$0xff] %vm644_vm5, %v1136_v12 }
 0x4d6   : > { %1490 = shalt.err (!%p1487_p4)
}
 0x4d7   : > { %s1491_s24 = scalar_lea.hbm %s1812_s11, 256  ;;  %s1495_s28 = scalar_lea.hbm %s1894_s25, 512 }
 0x4d8   : > { %p1492_p7 = scmp.ne.s32.totalorder %s1812_s11, %s1491_s24  ;;  %p1496_p10 = scmp.lt.u32.totalorder %s1812_s11, %s1894_s25 }
 0x4d9   : > { %p1497_p11 = scmp.lt.u32.totalorder %s1495_s28, %s1491_s24  ;;  %p1499_p13 = scmp.lt.u32.totalorder %s1491_s24, %s1812_s11 }
 0x4da   : > { %p1493_p8 = pnand %p1492_p7, %p1635_p5 }
 0x4db   : > { %p1498_p12 = por %p1497_p11, %p1496_p10 }
 0x4dc   : > { %p1494_p9 = pneg %p1493_p8 }
 0x4dd   : > { %p1500_p0 = por %p1499_p13, %p1498_p12 }
 0x4df   : > { %p1501_p1 = pnand %p1500_p0, %p1494_p9 }
 0x4e1   : > { %1504 = shalt.err (!%p1501_p1)
}
 0x4e2   : > { %s1545_s17 = smov 128   ;;  %s1546_s20 = smov 8  }
 0x4e3   : > { %1413 = dma.vmem_to_hbm [thread:$0]  (%p1635_p5), %s1814_s26, 256, %s1812_s11, %s1824_s15, %s1545_s17, %s1545_s17, %s1546_s20  }
 0x4e4 PF: > { %s1896_s27 = sld [smem:[#allocation8_spill]]  ;;  %s1897_s23 = sld [smem:[#allocation6_spill]] }
 0x4ea   : > { %p1419_p2 = scmp.ge.s32.totalorder %s1896_s27, 2  ;;  %s1170_s21 = sand.u32 1, %s1897_s23  }
 0x4eb   : > { %s1171_s13 = scalar_lea.sflag [#allocation4], %s1170_s21 }
 0x4ec   : > { %p1416_p3 = pnand %p1419_p2, %p1639_p6 }
 0x4ee   : > { %1522 = dma.done.wait (!%p1416_p3), %s1171_s13, 256  }
 0x4ef   : > { %1524 = vsyncadd (!%p1416_p3), %s1171_s13, 4294967040  ;;  %s1899_s12 = sld [smem:[#allocation9_spill]]  ;;  %s1900_s3 = sld [smem:[#allocation7_spill]] }
 0x4f0   : > { %s1901_s11 = sld [smem:[#allocation10_spill]]  ;;  %s1902_s30 = smov %s1531_s10 }
 0x4f5   : > { %p19_p4 = scmp.ge.s32.totalorder %s1899_s12, 4   ;;  %s1903_s10 = smov %s1900_s3 }
 0x4f7   :  { %21 = sbr.rel (!%p19_p4) target bundleno = 6 (0x6), region = 110 }
 0x4fe   :  { %1176 = vsyncpa [#allocation4], 1 }
 0x4ff   :  { %1178 = vsyncpa [#allocation4 + $0x1], 1 }

// kernel: tpu_custom_call.1
= control target key start
LH: loop header
LB: loop body
LE: loop exit
PB: predicated region body
PF: predicated region fallthrough
CT: control target
= control target key end

     0   :  { %s1865_s0 = inlined_call_operand.vmem [shape: f32[16,32], index: 0, kind: input, shape index: {}]   ;;  %s1866_s1 = inlined_call_operand.vmem [shape: bf16[2,16,8], index: 1, kind: input, shape index: {}]   ;;  %s1867_s2 = inlined_call_operand.vmem [shape: bf16[2,8,16], index: 2, kind: input, shape index: {}]   ;;  %s1868_s3 = inlined_call_operand.vmem [shape: f32[2,8,32], index: 3, kind: input, shape index: {}]   ;;  %s1869_s4 = inlined_call_operand.vmem [shape: f32[2,8,32], index: 4, kind: input, shape index: {}]   ;;  %s1870_s5 = inlined_call_operand.vmem [shape: bf16[2,32,128], index: 5, kind: input, shape index: {}]   ;;  %s1871_s6 = inlined_call_operand.vmem [shape: f32[2,1,128], index: 6, kind: input, shape index: {}]   ;;  %s1872_s7 = inlined_call_operand.vmem [shape: bf16[2,128,32], index: 7, kind: input, shape index: {}]   ;;  %s1873_s8 = inlined_call_operand.vmem [shape: f32[2,1,32], index: 8, kind: input, shape index: {}]   ;;  %s1874_s9 = inlined_call_operand.hbm [shape: f32[2,16,32], index: 9, kind: output, shape index: {}]  }
   0x1   :  { %1883 = sst [smem:[#allocation12_spill]] %s1868_s3 }
   0x2   :  { %1884 = sst [smem:[#allocation13_spill]] %s1874_s9 }
   0x3   :  { %14 = vsyncpa [#allocation4], 0 }
   0x4   :  { %16 = vsyncpa [#allocation4 + $0x1], 0  ;;  %s1597_s30 = smov 0   ;;  %s1599_s10 = smov 0  }
   0x5   :  { %s1601_s11 = smov 0   ;;  %s1603_s12 = smov 0  }
   0x6 LB: > { %1885 = sst [smem:[#allocation6_spill]] %s1527_s30  ;;  %s1618_s13 = sadd.s32 4294967295, %s1539_s12   ;;  %s1539_s12 = sphi %s1603_s12, %s1899_s12   ;;  %s1535_s11 = sphi %s1601_s11, %s1901_s11   ;;  %s1531_s10 = sphi %s1599_s10, %s1903_s10   ;;  %s1527_s30 = sphi %s1597_s30, %s1902_s30  }
   0x7   : > { %1886 = sst [smem:[#allocation7_spill]] %s1535_s11  ;;  %s1271_s14 = sadd.s32 4294967294, %s1539_s12  }
   0x8   : > { %1887 = sst [smem:[#allocation8_spill]] %s1539_s12  ;;  %s1622_s15 = sadd.s32 1, %s1539_s12  }
   0x9   : > { %1888 = sst [smem:[#allocation9_spill]] %s1622_s15  ;;  %s248_s16 = sadd.s32 1, %s1535_s11 }
   0xa   : > { %s245_s17 = ssub.s32 %s1539_s12, %s1622_s15  ;;  %p258_p0 = scmp.ne.s32.totalorder %s1535_s11, %s1531_s10 }
   0xb   : > { %p246_p1 = scmp.eq.s32.totalorder %s245_s17, 0  ;;  %p259_p2 = scmp.eq.s32.totalorder %s1618_s13, 1 }
   0xc   : > { %p264_p3 = scmp.ne.s32.totalorder %s1531_s10, %s1527_s30  ;;  %p265_p4 = scmp.eq.s32.totalorder %s1271_s14, 1 }
   0xd   : > { %s1633_s18 = scalar_select %p246_p1, %s1535_s11, %s248_s16  }
   0xe   : > { %p1635_p5 = por %p259_p2, %p258_p0  ;;  %p1639_p6 = por %p265_p4, %p264_p3 }
   0xf   : > { %1889 = sst [smem:[#allocation10_spill]] %s1633_s18  ;;  %p1274_p7 = scmp.ge.s32.totalorder %s1539_s12, 1 }
  0x10   : > { %s1891_s20 = scalar_select %p1639_p6, 1, 0 }
  0x11   : > { %p334_p8 = scmp.lt.s32.totalorder %s1539_s12, 3 }
  0x12   : > { %1892 = sst [smem:[#allocation11_spill]] %s1891_s20 }
  0x13   : > { %p335_p9 = pnand %p1274_p7, %p334_p8 }
  0x14   : > { %s1875_s21 = sand.u32 (!%p335_p9), 1, %s1531_s10   ;;  %p389_p10 = scmp.lt.s32.totalorder (!%p335_p9), %s1618_s13, 1 }
  0x15   : > { %338 = sbr.rel (%p335_p9) target bundleno = 1252 (0x4e4), region = 56  ;;  %s1275_s22 = sshll.u32 (!%p335_p9), %s1875_s21, 4 }
  0x16   : > { %s1893_s3 = sld [smem:[#allocation12_spill]] (!%p335_p9)  ;;  %p1282_p11 = scmp.ne.s32.totalorder (!%p335_p9), %s1618_s13, 0 }
  0x1c   : > { %s1650_s23 = scalar_select %p389_p10, %s1618_s13, 1 }
  0x1d   : > { %417 = sbr.rel (%p1282_p11) target bundleno = 36 (0x24), region = 60  ;;  %v418_v0 = vld [vmem:[%s1865_s0] sm:$0xff] (!%p1282_p11)  ;;  %vm420_vm0 = vcmask (!%p1282_p11), 261120   ;;  %v419_v1 = vld [vmem:[%s1865_s0 + $0x8] sm:$0xff] (!%p1282_p11) }
  0x1e   : > { %s1276_s24 = sshll.u32 %s1650_s23, 3  ;;  %s1331_s25 = sshll.u32 %s1650_s23, 4  ;;  %421 = vst.msk [vmem:[#allocation2] sm:$0xff] (!%p1282_p11), %vm420_vm0, %v418_v0  ;;  %422 = vst.msk [vmem:[#allocation2 + $0x8] sm:$0xff] (!%p1282_p11), %vm420_vm0, %v419_v1 }
  0x1f   : > { %s1657_s28 = scalar_lea.vmem %s1893_s3, %s1276_s24  ;;  %s1662_s16 = scalar_lea.vmem %s1869_s4, %s1276_s24 }
  0x20   : > { %s1667_s18 = scalar_lea.vmem %s1870_s5, %s1331_s25  ;;  %s404_s20 = scalar_lea.vmem %s1871_s6, %s1650_s23 }
  0x21   : > { %s1332_s30 = sshll.u32 %s1650_s23, 6  ;;  %s412_s26 = scalar_lea.vmem %s1873_s8, %s1650_s23 }
  0x22   : > { %s1681_s29 = scalar_lea.vmem %s1872_s7, %s1332_s30  ;;  %s1683_s24 = scalar_lea.vmem [#allocation3], %s1275_s22 }
  0x24 PF: > { %vm440_vm1 = vcmask 1043456   ;;  %v1541_v4 = vmov 0.0   ;;  %vm1542_vm2 = vmmov 0   ;;  %v1457_v7 = vld [vmem:[%s1866_s1] sm:$0xff]   ;;  %vm436_vm3 = vcmask 64512   ;;  %v1458_v10 = vld [vmem:[%s1866_s1 + $0x8] sm:$0xff]  }
  0x25   : > { %v1692_v2 = vld [vmem:[#allocation2] sm:$0xff]  ;;  %v1694_v3 = vld [vmem:[#allocation2 + $0x8] sm:$0xff]  ;;  %1357 = vmatprep.subr.bf16.mxu0 %v1541_v4  ;;  %1359 = vmatprep.mubr.msk.bf16.mxu0 %vm1542_vm2, %v1541_v4  ;;  %vm555_vm4 = vcmask 130048   ;;  %vm644_vm5 = vcmask 261120   ;;  %s1333_s23 = sshll.u32 %s1618_s13, 8  ;;  %s1894_s25 = sld [smem:[#allocation13_spill]] }
  0x26   : > { %v429_v5 = vpack.c.bf16 %v1692_v2, %v1692_v2  ;;  %v430_v6 = vpack.c.bf16 %v1694_v3, %v1694_v3  ;;  %v537_v12 = vld [vmem:[%s1657_s28] sm:$0xff]  ;;  %v1460_v38 = vld [vmem:[%s1667_s18 + $0x8] sm:$0xff]   ;;  %s1895_s13 = sand.u32 1, %s1531_s10   ;;  %s1544_s9 = smov [#allocation3]  }
  0x27   : > { %v538_v13 = vld [vmem:[%s1662_s16] sm:$0xff]  ;;  %s1824_s15 = scalar_lea.sflag [#allocation4], %s1895_s13  ;;  %s1481_s30 = sshll.u32 %s1544_s9, 4  ;;  %s1482_s30 = int_to_ptr.vmem [resolvable:$false] %s1481_s30 }
  0x28   : > { %v442_v8 = vsel %vm440_vm1, %v429_v5, 0  ;;  %v494_v9 = vsel %vm440_vm1, %v430_v6, 0  ;;  %v551_v26 = vld [vmem:[%s1867_s2] sm:$0xf]  ;;  %v552_v36 = vld [vmem:[%s1867_s2 + $0x4] sm:$0xf] }
  0x29   : > { %1358 = vmatpush3.bf16.msra.mxu0 %v442_v8  ;;  %v1459_v37 = vld [vmem:[%s1667_s18] sm:$0xff]   ;;  %s1483_s12 = scalar_lea.vmem %s1482_s30, 512 }
  0x2a   : > { %1363 = vmatprep.subr.bf16.mxu0 %v1541_v4 }
  0x2b   : > { %s1812_s11 = scalar_lea.hbm %s1894_s25, %s1333_s23 }
  0x2c   : > { %1360 = vmatmul.mubr.msk.bf16.vlgmr.msra.gmra.mrb[0].mxu0 %vm436_vm3, %v1457_v7 }
  0x2d   : > { %1364 = vmatpush3.bf16.msra.mxu0 %v494_v9  ;;  %1365 = vmatprep.mubr.msk.bf16.mxu0 %vm1542_vm2, %v1541_v4 }
  0x2e   : > { %1369 = vmatprep.subr.bf16.mxu0 %v1541_v4 }
  0x34   : > { %1366 = vmatmul.mubr.msk.bf16.vlgmr.msra.gmra.mrb[4].mxu0 %vm436_vm3, %v1458_v10 }
  0x35   : > { %1371 = vmatprep.mubr.msk.bf16.mxu0 %vm1542_vm2, %v1541_v4 }
  0xff   : > { %v478_v11 = vpop.f32.mrb[0].mxu0 }
 0x100   : > { %v1361_v14 = vpop.f32.mrb[1].mxu0  ;;  %v539_v16 = vmul.f32 %v537_v12, %v478_v11  ;;  %v545_v17 = vmul.f32 %v538_v13, %v478_v11 }
 0x101   : > { %v481_v15 = vpop.f32.mrb[2].mxu0 }
 0x102   : > { %v541_v18 = vmul.f32 %v538_v13, %v481_v15  ;;  %v547_v19 = vmul.f32 %v537_v12, %v481_v15  ;;  %v1362_v20 = vpop.f32.mrb[3].mxu0  ;;  %v1461_v15 = vld [vmem:[%s1681_s29] sm:$0xff]  }
 0x103   : > { %1389 = vmatprep.subr.bf16.mxu1 %v1461_v15  ;;  %v1466_v20 = vld [vmem:[%s1681_s29 + $0x28] sm:$0xff]  }
 0x104   : > { %v543_v21 = vsub.f32 %v539_v16, %v541_v18  ;;  %v549_v22 = vadd.f32 %v547_v19, %v545_v17  ;;  %1390 = vmatpush3.bf16.msra.mxu1 %v1461_v15  ;;  %v1462_v16 = vld [vmem:[%s1681_s29 + $0x8] sm:$0xff]   ;;  %v1463_v17 = vld [vmem:[%s1681_s29 + $0x10] sm:$0xff]   ;;  %v1464_v18 = vld [vmem:[%s1681_s29 + $0x18] sm:$0xff]  }
 0x105   : > { %1391 = vmatprep.subr.bf16.mxu1 %v1462_v16  ;;  %v1465_v19 = vld [vmem:[%s1681_s29 + $0x20] sm:$0xff]  }
 0x106   : > { %v553_v23 = vpack.c.bf16 %v549_v22, %v543_v21  ;;  %v1467_v21 = vld [vmem:[%s1681_s29 + $0x30] sm:$0xff]   ;;  %v1468_v22 = vld [vmem:[%s1681_s29 + $0x38] sm:$0xff]  }
 0x107   : > { %v530_v24 = vpop.f32.mrb[4].mxu0 }
 0x108   : > { %v1367_v25 = vpop.f32.mrb[5].mxu0  ;;  %1370 = vmatpush3.bf16.msra.mxu0 %v553_v23  ;;  %v540_v28 = vmul.f32 %v537_v12, %v530_v24  ;;  %v546_v29 = vmul.f32 %v538_v13, %v530_v24  ;;  %1392 = vmatpush3.bf16.msra.mxu1 %v1462_v16  ;;  %v1289_v23 = vld [vmem:[%s404_s20] ss:$0 sm:$0xff] }
 0x109   : > { %v533_v27 = vpop.f32.mrb[6].mxu0  ;;  %1375 = vmatprep.subr.bf16.mxu0 %v1541_v4  ;;  %1393 = vmatprep.subr.bf16.mxu1 %v1463_v17 }
 0x10a   : > { %v542_v30 = vmul.f32 %v538_v13, %v533_v27  ;;  %v548_v31 = vmul.f32 %v537_v12, %v533_v27  ;;  %v1368_v32 = vpop.f32.mrb[7].mxu0 }
 0x10b   : > { %1372 = vmatmul.mubr.msk.bf16.vlgmr.msra.gmra.mrb[8].mxu0 %vm555_vm4, %v551_v26 }
 0x10c   : > { %v544_v33 = vsub.f32 %v540_v28, %v542_v30  ;;  %v550_v34 = vadd.f32 %v548_v31, %v546_v29  ;;  %1377 = vmatprep.mubr.msk.bf16.mxu0 %vm1542_vm2, %v1541_v4  ;;  %1394 = vmatpush3.bf16.msra.mxu1 %v1463_v17 }
 0x10d   : > { %1395 = vmatprep.subr.bf16.mxu1 %v1464_v18 }
 0x10e   : > { %v554_v35 = vpack.c.bf16 %v550_v34, %v544_v33 }
 0x110   : > { %1376 = vmatpush3.bf16.msra.mxu0 %v554_v35  ;;  %1396 = vmatpush3.bf16.msra.mxu1 %v1464_v18 }
 0x111   : > { %1381 = vmatprep.subr.bf16.mxu0 %v1541_v4  ;;  %1397 = vmatprep.subr.bf16.mxu1 %v1465_v19 }
 0x113   : > { %1378 = vmatmul.mubr.msk.bf16.vlgmr.msra.gmra.mrb[12].mxu0 %vm555_vm4, %v552_v36 }
 0x114   : > { %1385 = vmatprep.mubr.msk.bf16.mxu0 %vm1542_vm2, %v1541_v4  ;;  %1382 = vmatpush3.bf16.msra.mxu0 %v1459_v37 }
 0x115   : > { %1383 = vmatprep.subr.bf16.mxu0 %v1541_v4  ;;  %1398 = vmatpush3.bf16.msra.mxu1 %v1465_v19 }
 0x116   : > { %1399 = vmatprep.subr.bf16.mxu1 %v1466_v20 }
 0x118   : > { %1384 = vmatpush3.bf16.msra.mxu0 %v1460_v38 }
 0x119   : > { %1400 = vmatpush3.bf16.msra.mxu1 %v1466_v20 }
 0x11a   : > { %1401 = vmatprep.subr.bf16.mxu1 %v1467_v21 }
 0x11d   : > { %1402 = vmatpush3.bf16.msra.mxu1 %v1467_v21 }
 0x11e   : > { %1403 = vmatprep.subr.bf16.mxu1 %v1468_v22 }
 0x121   : > { %1404 = vmatpush3.bf16.msra.mxu1 %v1468_v22 }
 0x1de   : > { %v593_v39 = vpop.f32.mrb[8].mxu0 }
 0x1df   : > { %v1373_v40 = vpop.f32.mrb[9].mxu0  ;;  %v642_v43 = vadd.f32 %v593_v39, %v1692_v2 }
 0x1e0   : > { %v596_v41 = vpop.f32.mrb[10].mxu0 }
 0x1e1   : > { %v1374_v42 = vpop.f32.mrb[11].mxu0  ;;  %v645_v48 = vsel %vm644_vm5, %v642_v43, 0.0 }
 0x1e6   : > { %v636_v44 = vpop.f32.mrb[12].mxu0 }
 0x1e7   : > { %v643_v45 = vadd.f32 %v636_v44, %v1694_v3  ;;  %v1379_v46 = vpop.f32.mrb[13].mxu0 }
 0x1e8   : > { %v639_v47 = vpop.f32.mrb[14].mxu0 }
 0x1e9   : > { %v646_v49 = vsel %vm644_vm5, %v643_v45, 0.0  ;;  %v1380_v50 = vpop.f32.mrb[15].mxu0 }
 0x1ea   : > { %v647_v51 = vadd.f32 %v646_v49, %v645_v48 }
 0x1ec   : > { %v648_v52 = vrot.slane %v647_v51, 4 }
 0x1ee   : > { %v649_v53 = vadd.f32 %v648_v52, %v647_v51 }
 0x1f0   : > { %v650_v54 = vrot.slane %v649_v53, 2 }
 0x1f2   : > { %v651_v55 = vadd.f32 %v650_v54, %v649_v53 }
 0x1f4   : > { %v652_v56 = vrot.slane %v651_v55, 1 }
 0x1f6   : > { %v653_v57 = vadd.f32 %v652_v56, %v651_v55 }
 0x1f8   : > { %v654_v58 = vmul.f32 0.0625, %v653_v57 }
 0x1fa   : > { %v655_v59 = vsub.f32 %v642_v43, %v654_v58  ;;  %v656_v60 = vsub.f32 %v643_v45, %v654_v58 }
 0x1fc   : > { %v657_v61 = vmul.f32 %v655_v59, %v655_v59  ;;  %v658_v62 = vmul.f32 %v656_v60, %v656_v60 }
 0x1fe   : > { %v659_v63 = vsel %vm644_vm5, %v657_v61, 0.0  ;;  %v660_v0 = vsel %vm644_vm5, %v658_v62, 0.0 }
 0x1ff   : > { %v661_v1 = vadd.f32 %v660_v0, %v659_v63 }
 0x201   : > { %v662_v2 = vrot.slane %v661_v1, 4 }
 0x203   : > { %v663_v3 = vadd.f32 %v662_v2, %v661_v1 }
 0x205   : > { %v664_v5 = vrot.slane %v663_v3, 2 }
 0x207   : > { %v665_v6 = vadd.f32 %v664_v5, %v663_v3 }
 0x209   : > { %v666_v7 = vrot.slane %v665_v6, 1 }
 0x20b   : > { %v667_v8 = vadd.f32 %v666_v7, %v665_v6 }
 0x20d   : > { %v668_v9 = vmul.f32 0.0625, %v667_v8 }
 0x20f   : > { %v669_v10 = vadd.f32 1e-05, %v668_v9 }
 0x211   : > { %1469 = vrsqrt.f32 %v669_v10 }
 0x21b   : > { %v1470_v11 = vpop.eup %1469 }
 0x21c   : > { %v1740_v12 = vmul.f32 %v1470_v11, %v655_v59  ;;  %v1742_v13 = vmul.f32 %v1470_v11, %v656_v60  ;;  %v1543_v60 = vmov 1.0|1.0  }
 0x21e   : > { %v673_v14 = vpack.c.bf16 %v1742_v13, %v1740_v12 }
 0x220   : > { %1386 = vmatmul.mubr.msk.bf16.vlgmr.msra.gmra.mrb[16].mxu0 %vm644_vm5, %v673_v14 }
 0x2f3   : > { %v734_v24 = vpop.f32.mrb[16].mxu0 }
 0x2f4   : > { %v1387_v25 = vpop.f32.mrb[17].mxu0  ;;  %v735_v27 = vadd.f32 %v1289_v23, %v734_v24 }
 0x2f5   : > { %v737_v26 = vpop.f32.mrb[18].mxu0 }
 0x2f6   : > { %v738_v28 = vadd.f32 %v1289_v23, %v737_v26  ;;  %v1388_v29 = vpop.f32.mrb[19].mxu0 }
 0x2f8   : > { %v741_v30 = vadd.f32 %v738_v28, %v735_v27 }
 0x2fa   : > { %v742_v31 = vrot.slane %v741_v30, 4 }
 0x2fc   : > { %v743_v32 = vadd.f32 %v742_v31, %v741_v30 }
 0x2fe   : > { %v744_v33 = vrot.slane %v743_v32, 2 }
 0x300   : > { %v745_v34 = vadd.f32 %v744_v33, %v743_v32  ;;  %v1301_v32 = vld [vmem:[%s412_s26] ss:$0 sm:$0xff]  ;;  %s1155_s26 = sshll.u32 %s1683_s24, 4  ;;  %s1814_s26 = int_to_ptr.vmem [resolvable:$true] %s1155_s26 }
 0x301   : > { %s1477_s3 = scalar_lea.vmem %s1814_s26, 256  ;;  %p1484_p1 = scmp.lt.s32.totalorder %s1814_s26, %s1482_s30 }
 0x302   : > { %v746_v35 = vrot.slane %v745_v34, 1  ;;  %p1478_p12 = scmp.ne.s32.totalorder %s1814_s26, %s1477_s3  ;;  %p1485_p2 = scmp.lt.s32.totalorder %s1483_s12, %s1477_s3 }
 0x304   : > { %v747_v36 = vadd.f32 %v746_v35, %v745_v34  ;;  %p1479_p13 = pnand %p1478_p12, %p1635_p5  ;;  %p1486_p3 = por %p1485_p2, %p1484_p1 }
 0x306   : > { %v748_v37 = vmul.f32 0.0625, %v747_v36  ;;  %p1480_p0 = pneg %p1479_p13 }
 0x308   : > { %v749_v38 = vsub.f32 %v735_v27, %v748_v37  ;;  %v750_v39 = vsub.f32 %v738_v28, %v748_v37  ;;  %p1487_p4 = pnand %p1486_p3, %p1480_p0 }
 0x30a   : > { %v751_v40 = vmul.f32 %v749_v38, %v749_v38  ;;  %v752_v41 = vmul.f32 %v750_v39, %v750_v39 }
 0x30c   : > { %v753_v42 = vadd.f32 %v752_v41, %v751_v40 }
 0x30e   : > { %v754_v43 = vrot.slane %v753_v42, 4 }
 0x310   : > { %v755_v44 = vadd.f32 %v754_v43, %v753_v42 }
 0x312   : > { %v756_v45 = vrot.slane %v755_v44, 2 }
 0x314   : > { %v757_v46 = vadd.f32 %v756_v45, %v755_v44 }
 0x316   : > { %v758_v47 = vrot.slane %v757_v46, 1 }
 0x318   : > { %v759_v48 = vadd.f32 %v758_v47, %v757_v46 }
 0x31a   : > { %v760_v49 = vmul.f32 0.0625, %v759_v48 }
 0x31c   : > { %v761_v50 = vadd.f32 1e-05, %v760_v49 }
 0x31e   : > { %1471 = vrsqrt.f32 %v761_v50 }
 0x328   : > { %v1472_v51 = vpop.eup %1471 }
 0x329   : > { %v763_v52 = vmul.f32 %v1472_v51, %v749_v38  ;;  %v764_v53 = vmul.f32 %v1472_v51, %v750_v39 }
 0x32b   : > { %v765_v54 = vmul.f32 0.5, %v763_v52  ;;  %v766_v55 = vmul.f32 0.5, %v764_v53 }
 0x32d   : > { %vm769_vm6 = vcmp.ge.f32.partialorder %v765_v54, 1.0  ;;  %vm770_vm7 = vcmp.ge.f32.partialorder %v766_v55, 1.0 }
 0x32e   : > { %v1293_v56 = vsel %vm769_vm6, 1.0, %v1541_v4  ;;  %v1294_v57 = vsel %vm770_vm7, 1.0, %v1541_v4  ;;  %vm1310_vm8 = vmpackc.low %vm770_vm7, %vm769_vm6 }
 0x32f   : > { %v776_v58 = vsub.f32 1.0, %v1293_v56  ;;  %v777_v59 = vsub.f32 1.0, %v1294_v57  ;;  %1405 = vmatprep.mubr.msk.bf16.mxu1 %vm1310_vm8, %v1543_v60 }
 0x331   : > { %v778_v61 = vmul.f32 %v776_v58, %v765_v54  ;;  %v779_v62 = vmul.f32 %v777_v59, %v766_v55 }
 0x333   : > { %v780_v63 = vsub.f32 %v763_v52, %v778_v61  ;;  %v781_v0 = vsub.f32 %v764_v53, %v779_v62 }
 0x335   : > { %v782_v1 = vmul.f32 0.5, %v780_v63  ;;  %v783_v2 = vmul.f32 0.5, %v781_v0 }
 0x337   : > { %v784_v3 = vadd.f32 %v782_v1, %v778_v61  ;;  %v785_v5 = vadd.f32 %v783_v2, %v779_v62 }
 0x339   : > { %vm786_vm9 = vcmp.ge.f32.partialorder %v784_v3, 1.0  ;;  %vm787_vm10 = vcmp.ge.f32.partialorder %v785_v5, 1.0 }
 0x33a   : > { %v1295_v6 = vsel %vm786_vm9, 1.0, %v1541_v4  ;;  %v1296_v7 = vsel %vm787_vm10, 1.0, %v1541_v4  ;;  %vm1312_vm11 = vmpackc.low %vm787_vm10, %vm786_vm9 }
 0x33b   : > { %v793_v8 = vsub.f32 1.0, %v1295_v6  ;;  %v794_v9 = vsub.f32 1.0, %v1296_v7  ;;  %1406 = vmatmul.mubr.msk.bf16.vlgmr.msra.gmra.mrb[0].mxu1 %vm1312_vm11, %v1543_v60 }
 0x33d   : > { %v795_v10 = vmul.f32 %v793_v8, %v784_v3  ;;  %v796_v11 = vmul.f32 %v794_v9, %v785_v5 }
 0x33f   : > { %v797_v14 = vsub.f32 %v763_v52, %v795_v10  ;;  %v798_v15 = vsub.f32 %v764_v53, %v796_v11 }
 0x341   : > { %v799_v16 = vmul.f32 0.5, %v797_v14  ;;  %v800_v17 = vmul.f32 0.5, %v798_v15 }
 0x343   : > { %v801_v18 = vadd.f32 %v799_v16, %v795_v10  ;;  %v802_v19 = vadd.f32 %v800_v17, %v796_v11 }
 0x345   : > { %vm803_vm12 = vcmp.ge.f32.partialorder %v801_v18, 1.0  ;;  %vm804_vm13 = vcmp.ge.f32.partialorder %v802_v19, 1.0 }
 0x346   : > { %v1297_v20 = vsel %vm803_vm12, 1.0, %v1541_v4  ;;  %v1298_v21 = vsel %vm804_vm13, 1.0, %v1541_v4  ;;  %vm1314_vm14 = vmpackc.low %vm804_vm13, %vm803_vm12 }
 0x347   : > { %v810_v22 = vsub.f32 1.0, %v1297_v20  ;;  %v811_v23 = vsub.f32 1.0, %v1298_v21  ;;  %1409 = vmatprep.mubr.msk.bf16.mxu1 %vm1314_vm14, %v1543_v60 }
 0x349   : > { %v812_v24 = vmul.f32 %v810_v22, %v801_v18  ;;  %v813_v25 = vmul.f32 %v811_v23, %v802_v19 }
 0x34b   : > { %v814_v26 = vsub.f32 %v763_v52, %v812_v24  ;;  %v815_v27 = vsub.f32 %v764_v53, %v813_v25 }
 0x34d   : > { %v816_v28 = vmul.f32 0.5, %v814_v26  ;;  %v817_v29 = vmul.f32 0.5, %v815_v27 }
 0x34f   : > { %v818_v30 = vadd.f32 %v816_v28, %v812_v24  ;;  %v819_v31 = vadd.f32 %v817_v29, %v813_v25 }
 0x351   : > { %vm820_vm15 = vcmp.ge.f32.partialorder %v818_v30, 1.0  ;;  %vm821_vm0 = vcmp.ge.f32.partialorder %v819_v31, 1.0 }
 0x352   : > { %vm1316_vm1 = vmpackc.low %vm821_vm0, %vm820_vm15 }
 0x353   : > { %1410 = vmatmul.mubr.msk.bf16.gmra.mrb[4].mxu1 %vm1316_vm1, %v1543_v60 }
 0x40e   : > { %v1407_v33 = vpop.f32.mrb[0].mxu1 }
 0x40f   : > { %v932_v34 = vpop.f32.mrb[1].mxu1  ;;  %v941_v35 = vadd.f32 %v1407_v33, %v1301_v32 }
 0x410   : > { %v933_v36 = vadd.f32 %v1301_v32, %v932_v34  ;;  %v1408_v37 = vpop.f32.mrb[2].mxu1 }
 0x411   : > { %v935_v38 = vpop.f32.mrb[3].mxu1  ;;  %v944_v40 = vadd.f32 %v1408_v37, %v1301_v32  ;;  %v965_v42 = vadd.f32 %v941_v35, %v1740_v12 }
 0x412   : > { %v963_v39 = vadd.f32 %v933_v36, %v1740_v12  ;;  %v936_v41 = vadd.f32 %v1301_v32, %v935_v38 }
 0x413   : > { %v966_v45 = vadd.f32 %v944_v40, %v1742_v13  ;;  %v974_v48 = vsel %vm644_vm5, %v965_v42, 0.0 }
 0x414   : > { %v964_v43 = vadd.f32 %v936_v41, %v1742_v13  ;;  %v971_v44 = vsel %vm644_vm5, %v963_v39, 0.0 }
 0x415   : > { %v976_v50 = vsel %vm644_vm5, %v966_v45, 0.0 }
 0x416   : > { %v972_v46 = vsel %vm644_vm5, %v964_v43, 0.0 }
 0x417   : > { %v973_v47 = vadd.f32 %v972_v46, %v971_v44 }
 0x419   : > { %v975_v49 = vadd.f32 %v974_v48, %v973_v47 }
 0x41b   : > { %v977_v51 = vadd.f32 %v976_v50, %v975_v49 }
 0x426   : > { %v1411_v52 = vpop.f32.mrb[4].mxu1 }
 0x427   : > { %v948_v53 = vpop.f32.mrb[5].mxu1  ;;  %v957_v54 = vadd.f32 %v1411_v52, %v1301_v32 }
 0x428   : > { %v949_v55 = vadd.f32 %v1301_v32, %v948_v53  ;;  %v1412_v56 = vpop.f32.mrb[6].mxu1 }
 0x429   : > { %v951_v57 = vpop.f32.mrb[7].mxu1  ;;  %v960_v59 = vadd.f32 %v1412_v56, %v1301_v32  ;;  %v969_v61 = vadd.f32 %v957_v54, %v1740_v12 }
 0x42a   : > { %v967_v58 = vadd.f32 %v949_v55, %v1740_v12  ;;  %v952_v60 = vadd.f32 %v1301_v32, %v951_v57 }
 0x42b   : > { %v970_v1 = vadd.f32 %v960_v59, %v1742_v13  ;;  %v982_v5 = vsel %vm644_vm5, %v969_v61, 0.0 }
 0x42c   : > { %v978_v62 = vsel %vm644_vm5, %v967_v58, 0.0  ;;  %v968_v63 = vadd.f32 %v952_v60, %v1742_v13 }
 0x42d   : > { %v979_v0 = vadd.f32 %v978_v62, %v977_v51  ;;  %v984_v7 = vsel %vm644_vm5, %v970_v1, 0.0 }
 0x42e   : > { %v980_v2 = vsel %vm644_vm5, %v968_v63, 0.0 }
 0x42f   : > { %v981_v3 = vadd.f32 %v980_v2, %v979_v0 }
 0x431   : > { %v983_v6 = vadd.f32 %v982_v5, %v981_v3 }
 0x433   : > { %v985_v8 = vadd.f32 %v984_v7, %v983_v6 }
 0x435   : > { %v986_v9 = vrot.slane %v985_v8, 4 }
 0x437   : > { %v987_v10 = vadd.f32 %v986_v9, %v985_v8 }
 0x439   : > { %v988_v11 = vrot.slane %v987_v10, 2 }
 0x43b   : > { %v989_v12 = vadd.f32 %v988_v11, %v987_v10 }
 0x43d   : > { %v990_v14 = vrot.slane %v989_v12, 1 }
 0x43f   : > { %v991_v15 = vadd.f32 %v990_v14, %v989_v12 }
 0x441   : > { %v992_v16 = vmul.f32 0.015625, %v991_v15 }
 0x443   : > { %v993_v17 = vsub.f32 %v963_v39, %v992_v16  ;;  %v994_v18 = vsub.f32 %v964_v43, %v992_v16  ;;  %v995_v19 = vsub.f32 %v965_v42, %v992_v16  ;;  %v996_v13 = vsub.f32 %v966_v45, %v992_v16 }
 0x444   : > { %v997_v20 = vsub.f32 %v967_v58, %v992_v16  ;;  %v998_v21 = vsub.f32 %v968_v63, %v992_v16  ;;  %v999_v22 = vsub.f32 %v969_v61, %v992_v16  ;;  %v1000_v23 = vsub.f32 %v970_v1, %v992_v16 }
 0x445   : > { %v1001_v24 = vmul.f32 %v993_v17, %v993_v17  ;;  %v1002_v25 = vmul.f32 %v994_v18, %v994_v18  ;;  %v1003_v26 = vmul.f32 %v995_v19, %v995_v19  ;;  %v1004_v27 = vmul.f32 %v996_v13, %v996_v13 }
 0x446   : > { %v1005_v31 = vmul.f32 %v997_v20, %v997_v20  ;;  %v1006_v34 = vmul.f32 %v998_v21, %v998_v21  ;;  %v1007_v37 = vmul.f32 %v999_v22, %v999_v22  ;;  %v1008_v40 = vmul.f32 %v1000_v23, %v1000_v23 }
 0x447   : > { %v1009_v28 = vsel %vm644_vm5, %v1001_v24, 0.0  ;;  %v1010_v29 = vsel %vm644_vm5, %v1002_v25, 0.0  ;;  %v1012_v32 = vsel %vm644_vm5, %v1003_v26, 0.0  ;;  %v1014_v35 = vsel %vm644_vm5, %v1004_v27, 0.0 }
 0x448   : > { %v1011_v30 = vadd.f32 %v1010_v29, %v1009_v28  ;;  %v1016_v38 = vsel %vm644_vm5, %v1005_v31, 0.0  ;;  %v1018_v41 = vsel %vm644_vm5, %v1006_v34, 0.0  ;;  %v1020_v43 = vsel %vm644_vm5, %v1007_v37, 0.0 }
 0x449   : > { %v1022_v45 = vsel %vm644_vm5, %v1008_v40, 0.0 }
 0x44a   : > { %v1013_v33 = vadd.f32 %v1012_v32, %v1011_v30 }
 0x44c   : > { %v1015_v36 = vadd.f32 %v1014_v35, %v1013_v33 }
 0x44e   : > { %v1017_v39 = vadd.f32 %v1016_v38, %v1015_v36 }
 0x450   : > { %v1019_v42 = vadd.f32 %v1018_v41, %v1017_v39 }
 0x452   : > { %v1021_v44 = vadd.f32 %v1020_v43, %v1019_v42 }
 0x454   : > { %v1023_v46 = vadd.f32 %v1022_v45, %v1021_v44 }
 0x456   : > { %v1024_v47 = vrot.slane %v1023_v46, 4 }
 0x458   : > { %v1025_v48 = vadd.f32 %v1024_v47, %v1023_v46 }
 0x45a   : > { %v1026_v49 = vrot.slane %v1025_v48, 2 }
 0x45c   : > { %v1027_v50 = vadd.f32 %v1026_v49, %v1025_v48 }
 0x45e   : > { %v1028_v51 = vrot.slane %v1027_v50, 1 }
 0x460   : > { %v1029_v52 = vadd.f32 %v1028_v51, %v1027_v50 }
 0x462   : > { %v1030_v53 = vmul.f32 0.015625, %v1029_v52 }
 0x464   : > { %v1031_v54 = vadd.f32 1e-05, %v1030_v53 }
 0x466   : > { %1473 = vrsqrt.f32 %v1031_v54 }
 0x470   : > { %v1474_v55 = vpop.eup %1473 }
 0x471   : > { %v1033_v56 = vmul.f32 %v1474_v55, %v993_v17  ;;  %v1034_v57 = vmul.f32 %v1474_v55, %v994_v18  ;;  %v1051_v58 = vmul.f32 %v1474_v55, %v995_v19  ;;  %v1052_v59 = vmul.f32 %v1474_v55, %v996_v13 }
 0x472   : > { %v1071_v60 = vmul.f32 %v1474_v55, %v997_v20  ;;  %v1072_v61 = vmul.f32 %v1474_v55, %v998_v21  ;;  %v1091_v62 = vmul.f32 %v1474_v55, %v999_v22  ;;  %v1092_v63 = vmul.f32 %v1474_v55, %v1000_v23 }
 0x473   : > { %v1035_v0 = vmul.f32 0.5, %v1033_v56  ;;  %v1036_v1 = vmul.f32 0.5, %v1034_v57 }
 0x475   : > { %vm1039_vm2 = vcmp.ge.f32.partialorder %v1035_v0, 1.0  ;;  %vm1040_vm3 = vcmp.ge.f32.partialorder %v1036_v1, 1.0 }
 0x476   : > { %v1318_v2 = vsel %vm1039_vm2, 1.0, %v1541_v4  ;;  %v1319_v3 = vsel %vm1040_vm3, 1.0, %v1541_v4 }
 0x477   : > { %v1047_v5 = vsub.f32 1.0, %v1318_v2  ;;  %v1048_v6 = vsub.f32 1.0, %v1319_v3 }
 0x479   : > { %v1049_v7 = vmul.f32 %v1047_v5, %v1035_v0  ;;  %v1050_v8 = vmul.f32 %v1048_v6, %v1036_v1 }
 0x47b   : > { %v1053_v9 = vsub.f32 %v1051_v58, %v1049_v7  ;;  %v1054_v10 = vsub.f32 %v1052_v59, %v1050_v8 }
 0x47d   : > { %v1055_v11 = vmul.f32 0.5, %v1053_v9  ;;  %v1056_v12 = vmul.f32 0.5, %v1054_v10 }
 0x47f   : > { %v1057_v14 = vadd.f32 %v1055_v11, %v1049_v7  ;;  %v1058_v15 = vadd.f32 %v1056_v12, %v1050_v8 }
 0x481   : > { %vm1059_vm4 = vcmp.ge.f32.partialorder %v1057_v14, 1.0  ;;  %vm1060_vm6 = vcmp.ge.f32.partialorder %v1058_v15, 1.0 }
 0x482   : > { %v1320_v16 = vsel %vm1059_vm4, 1.0, %v1541_v4  ;;  %v1321_v17 = vsel %vm1060_vm6, 1.0, %v1541_v4 }
 0x483   : > { %v1066_v18 = vadd.f32 %v1321_v17, %v1319_v3  ;;  %v1067_v19 = vsub.f32 1.0, %v1320_v16  ;;  %v1068_v13 = vsub.f32 1.0, %v1321_v17  ;;  %v1065_v20 = vadd.f32 %v1320_v16, %v1318_v2 }
 0x485   : > { %v1069_v21 = vmul.f32 %v1067_v19, %v1057_v14  ;;  %v1070_v22 = vmul.f32 %v1068_v13, %v1058_v15 }
 0x487   : > { %v1073_v23 = vsub.f32 %v1071_v60, %v1069_v21  ;;  %v1074_v24 = vsub.f32 %v1072_v61, %v1070_v22 }
 0x489   : > { %v1075_v25 = vmul.f32 0.5, %v1073_v23  ;;  %v1076_v26 = vmul.f32 0.5, %v1074_v24 }
 0x48b   : > { %v1077_v27 = vadd.f32 %v1075_v25, %v1069_v21  ;;  %v1078_v28 = vadd.f32 %v1076_v26, %v1070_v22 }
 0x48d   : > { %vm1079_vm7 = vcmp.ge.f32.partialorder %v1077_v27, 1.0  ;;  %vm1080_vm8 = vcmp.ge.f32.partialorder %v1078_v28, 1.0 }
 0x48e   : > { %v1322_v29 = vsel %vm1079_vm7, 1.0, %v1541_v4  ;;  %v1323_v30 = vsel %vm1080_vm8, 1.0, %v1541_v4 }
 0x48f   : > { %v1086_v31 = vadd.f32 %v1323_v30, %v1066_v18  ;;  %v1087_v32 = vsub.f32 1.0, %v1322_v29  ;;  %v1088_v33 = vsub.f32 1.0, %v1323_v30  ;;  %v1085_v34 = vadd.f32 %v1322_v29, %v1065_v20 }
 0x491   : > { %v1089_v35 = vmul.f32 %v1087_v32, %v1077_v27  ;;  %v1090_v36 = vmul.f32 %v1088_v33, %v1078_v28 }
 0x493   : > { %v1093_v37 = vsub.f32 %v1091_v62, %v1089_v35  ;;  %v1094_v38 = vsub.f32 %v1092_v63, %v1090_v36 }
 0x495   : > { %v1095_v39 = vmul.f32 0.5, %v1093_v37  ;;  %v1096_v40 = vmul.f32 0.5, %v1094_v38 }
 0x497   : > { %v1098_v41 = vadd.f32 %v1096_v40, %v1090_v36  ;;  %v1097_v42 = vadd.f32 %v1095_v39, %v1089_v35 }
 0x499   : > { %vm1100_vm9 = vcmp.ge.f32.partialorder %v1098_v41, 1.0  ;;  %vm1099_vm10 = vcmp.ge.f32.partialorder %v1097_v42, 1.0 }
 0x49a   : > { %v1325_v43 = vsel %vm1100_vm9, 1.0, %v1541_v4  ;;  %v1324_v44 = vsel %vm1099_vm10, 1.0, %v1541_v4 }
 0x49b   : > { %v1106_v45 = vadd.f32 %v1325_v43, %v1086_v31  ;;  %v1105_v46 = vadd.f32 %v1324_v44, %v1085_v34 }
 0x49d   : > { %v1108_v47 = vmul.f32 0.25, %v1106_v45  ;;  %v1107_v48 = vmul.f32 0.25, %v1105_v46 }
 0x49f   : > { %v1110_v49 = vsel %vm644_vm5, %v1108_v47, 0.0  ;;  %v1109_v50 = vsel %vm644_vm5, %v1107_v48, 0.0 }
 0x4a0   : > { %v1111_v51 = vadd.f32 %v1110_v49, %v1109_v50 }
 0x4a2   : > { %v1112_v52 = vrot.slane %v1111_v51, 4 }
 0x4a4   : > { %v1113_v53 = vadd.f32 %v1112_v52, %v1111_v51 }
 0x4a6   : > { %v1114_v54 = vrot.slane %v1113_v53, 2 }
 0x4a8   : > { %v1115_v55 = vadd.f32 %v1114_v54, %v1113_v53 }
 0x4aa   : > { %v1116_v56 = vrot.slane %v1115_v55, 1 }
 0x4ac   : > { %v1117_v57 = vadd.f32 %v1116_v56, %v1115_v55 }
 0x4ae   : > { %v1118_v58 = vmul.f32 0.0625, %v1117_v57 }
 0x4b0   : > { %v1119_v59 = vsub.f32 %v1107_v48, %v1118_v58  ;;  %v1120_v60 = vsub.f32 %v1108_v47, %v1118_v58 }
 0x4b2   : > { %v1121_v4 = vmul.f32 %v1119_v59, %v1119_v59  ;;  %v1122_v61 = vmul.f32 %v1120_v60, %v1120_v60 }
 0x4b4   : > { %v1123_v62 = vsel %vm644_vm5, %v1121_v4, 0.0  ;;  %v1124_v63 = vsel %vm644_vm5, %v1122_v61, 0.0 }
 0x4b5   : > { %v1125_v0 = vadd.f32 %v1124_v63, %v1123_v62 }
 0x4b7   : > { %v1126_v1 = vrot.slane %v1125_v0, 4 }
 0x4b9   : > { %v1127_v2 = vadd.f32 %v1126_v1, %v1125_v0 }
 0x4bb   : > { %v1128_v3 = vrot.slane %v1127_v2, 2 }
 0x4bd   : > { %v1129_v5 = vadd.f32 %v1128_v3, %v1127_v2 }
 0x4bf   : > { %v1130_v6 = vrot.slane %v1129_v5, 1 }
 0x4c1   : > { %v1131_v7 = vadd.f32 %v1130_v6, %v1129_v5 }
 0x4c3   : > { %v1132_v8 = vmul.f32 0.0625, %v1131_v7 }
 0x4c5   : > { %v1133_v9 = vadd.f32 1e-05, %v1132_v8 }
 0x4c7   : > { %1475 = vrsqrt.f32 %v1133_v9 }
 0x4d1   : > { %v1476_v10 = vpop.eup %1475 }
 0x4d2   : > { %v1135_v11 = vmul.f32 %v1476_v10, %v1119_v59  ;;  %v1136_v12 = vmul.f32 %v1476_v10, %v1120_v60 }
 0x4d4   : > { %1137 = vst.msk [vmem:[#allocation2] sm:$0xff] %vm644_vm5, %v1135_v11  ;;  %1138 = vst.msk [vmem:[#allocation2 + $0x8] sm:$0xff] %vm644_vm5, %v1136_v12 }
 0x4d5   : > { %1139 = vst.msk [vmem:[%s1683_s24] sm:$0xff] %vm644_vm5, %v1135_v11  ;;  %1140 = vst.msk [vmem:[%s1683_s24 + $0x8] sm:$0xff] %vm644_vm5, %v1136_v12 }
 0x4d6   : > { %1490 = shalt.err (!%p1487_p4)
}
 0x4d7   : > { %s1491_s24 = scalar_lea.hbm %s1812_s11, 256  ;;  %s1495_s28 = scalar_lea.hbm %s1894_s25, 512 }
 0x4d8   : > { %p1492_p7 = scmp.ne.s32.totalorder %s1812_s11, %s1491_s24  ;;  %p1496_p10 = scmp.lt.u32.totalorder %s1812_s11, %s1894_s25 }
 0x4d9   : > { %p1497_p11 = scmp.lt.u32.totalorder %s1495_s28, %s1491_s24  ;;  %p1499_p13 = scmp.lt.u32.totalorder %s1491_s24, %s1812_s11 }
 0x4da   : > { %p1493_p8 = pnand %p1492_p7, %p1635_p5 }
 0x4db   : > { %p1498_p12 = por %p1497_p11, %p1496_p10 }
 0x4dc   : > { %p1494_p9 = pneg %p1493_p8 }
 0x4dd   : > { %p1500_p0 = por %p1499_p13, %p1498_p12 }
 0x4df   : > { %p1501_p1 = pnand %p1500_p0, %p1494_p9 }
 0x4e1   : > { %1504 = shalt.err (!%p1501_p1)
}
 0x4e2   : > { %s1545_s17 = smov 128   ;;  %s1546_s20 = smov 8  }
 0x4e3   : > { %1413 = dma.vmem_to_hbm [thread:$0]  (%p1635_p5), %s1814_s26, 256, %s1812_s11, %s1824_s15, %s1545_s17, %s1545_s17, %s1546_s20  }
 0x4e4 PF: > { %s1896_s27 = sld [smem:[#allocation8_spill]]  ;;  %s1897_s23 = sld [smem:[#allocation6_spill]] }
 0x4ea   : > { %p1419_p2 = scmp.ge.s32.totalorder %s1896_s27, 2  ;;  %s1170_s21 = sand.u32 1, %s1897_s23  }
 0x4eb   : > { %s1171_s13 = scalar_lea.sflag [#allocation4], %s1170_s21 }
 0x4ec   : > { %p1416_p3 = pnand %p1419_p2, %p1639_p6 }
 0x4ee   : > { %1522 = dma.done.wait (!%p1416_p3), %s1171_s13, 256  }
 0x4ef   : > { %1524 = vsyncadd (!%p1416_p3), %s1171_s13, 4294967040  ;;  %s1899_s12 = sld [smem:[#allocation9_spill]]  ;;  %s1900_s3 = sld [smem:[#allocation7_spill]] }
 0x4f0   : > { %s1901_s11 = sld [smem:[#allocation10_spill]]  ;;  %s1902_s30 = smov %s1531_s10 }
 0x4f5   : > { %p19_p4 = scmp.ge.s32.totalorder %s1899_s12, 4   ;;  %s1903_s10 = smov %s1900_s3 }
 0x4f7   :  { %21 = sbr.rel (!%p19_p4) target bundleno = 6 (0x6), region = 110 }
 0x4fe   :  { %1176 = vsyncpa [#allocation4], 1 }
 0x4ff   :  { %1178 = vsyncpa [#allocation4 + $0x1], 1 }

</bundles_post_ra>
